<compile_context>
chip_gen: v7x
topology: tpu7x:2x2x1
jax: 0.10.0
libtpu: 0.0.40
codegen_flags: <defaults>
</compile_context>

<pallas_src>
import functools
import math

import jax
import jax.numpy as jnp
import numpy as np
from jax.experimental import pallas as pl
from jax.experimental.pallas import tpu as pltpu


# ----------------------------- Pallas kernel --------------------------------
def _sparse_attn_kernel(eidx_ref,            # scalar-prefetch (SMEM), used by index_maps
                        x_ref, wqkv_ref, wo_ref, b_ref, o_ref, *, dim, scale):
    x = x_ref[0]                                            # (S, D) bf16
    bias = b_ref[0]                                         # (4, D) f32

    # fused QKV projection: one wide (D x 3D) MXU matmul, f32 accumulation
    qkv = jnp.dot(x, wqkv_ref[0], preferred_element_type=jnp.float32)   # (S, 3D)
    q = (qkv[:, :dim] + bias[0:1, :]) * scale               # fold 1/sqrt(D) into q
    k = qkv[:, dim:2 * dim] + bias[1:2, :]
    v = qkv[:, 2 * dim:] + bias[2:3, :]

    # scores = q @ k^T without materializing a transpose (contract last axes)
    s = jax.lax.dot_general(
        q.astype(jnp.bfloat16), k.astype(jnp.bfloat16),
        dimension_numbers=(((1,), (1,)), ((), ())),
        preferred_element_type=jnp.float32)                 # (S, S) f32

    # numerically-stable softmax in f32; reciprocal goes to the (idle) EUP slot
    m = jnp.max(s, axis=-1, keepdims=True)
    e = jnp.exp(s - m)
    p = e * pl.reciprocal(jnp.sum(e, axis=-1, keepdims=True), approx=True)

    av = jnp.dot(p.astype(jnp.bfloat16), v.astype(jnp.bfloat16),
                 preferred_element_type=jnp.float32)        # (S, D) f32
    out = jnp.dot(av.astype(jnp.bfloat16), wo_ref[0],
                  preferred_element_type=jnp.float32) + bias[3:4, :]
    o_ref[0] = out.astype(o_ref.dtype)


def sparse_self_attention_pallas(x_bf16, expert_idx, wqkv, wo, bias):
    """x_bf16: (B, S, D) bf16; expert_idx: (B,) int32;
    wqkv: (E, D, 3D) bf16; wo: (E, D, D) bf16; bias: (E, 4, D) f32."""
    B, S, D = x_bf16.shape
    grid_spec = pltpu.PrefetchScalarGridSpec(
        num_scalar_prefetch=1,
        grid=(B,),
        in_specs=[
            pl.BlockSpec((1, S, D), lambda b, eidx: (b, 0, 0)),
            pl.BlockSpec((1, D, 3 * D), lambda b, eidx: (eidx[b], 0, 0)),
            pl.BlockSpec((1, D, D), lambda b, eidx: (eidx[b], 0, 0)),
            pl.BlockSpec((1, 4, D), lambda b, eidx: (eidx[b], 0, 0)),
        ],
        out_specs=pl.BlockSpec((1, S, D), lambda b, eidx: (b, 0, 0)),
    )
    return pl.pallas_call(
        functools.partial(_sparse_attn_kernel, dim=D, scale=1.0 / math.sqrt(D)),
        out_shape=jax.ShapeDtypeStruct((B, S, D), jnp.float32),
        grid_spec=grid_spec,
        compiler_params=pltpu.CompilerParams(dimension_semantics=("parallel",)),
    )(expert_idx, x_bf16, wqkv, wo, bias)


# ------------------------------ Module wrapper -------------------------------
def init_params(key, *, d_model, seq_len, n_experts):
    ks = jax.random.split(key, 10)
    scale = 0.02
    return {
        "switch_w": scale * jax.random.normal(ks[0], (n_experts, seq_len * d_model), jnp.float32),
        "switch_b": jnp.zeros((n_experts,), jnp.float32),
        "wq": scale * jax.random.normal(ks[1], (n_experts, d_model, d_model), jnp.float32),
        "wk": scale * jax.random.normal(ks[2], (n_experts, d_model, d_model), jnp.float32),
        "wv": scale * jax.random.normal(ks[3], (n_experts, d_model, d_model), jnp.float32),
        "wo": scale * jax.random.normal(ks[4], (n_experts, d_model, d_model), jnp.float32),
        "bq": scale * jax.random.normal(ks[5], (n_experts, d_model), jnp.float32),
        "bk": scale * jax.random.normal(ks[6], (n_experts, d_model), jnp.float32),
        "bv": scale * jax.random.normal(ks[7], (n_experts, d_model), jnp.float32),
        "bo": scale * jax.random.normal(ks[8], (n_experts, d_model), jnp.float32),
    }


def pack_expert_params(params):
    """One-time layout pack (stored fused in a real model): fused QKV weight,
    bf16 projection weights, stacked biases."""
    wqkv = jnp.concatenate(
        [params["wq"], params["wk"], params["wv"]], axis=-1).astype(jnp.bfloat16)   # (E, D, 3D)
    wo = params["wo"].astype(jnp.bfloat16)                                           # (E, D, D)
    bias = jnp.stack(
        [params["bq"], params["bk"], params["bv"], params["bo"]], axis=1
    ).astype(jnp.float32)                                                            # (E, 4, D)
    return wqkv, wo, bias


def sparse_self_attention_forward(params, packed, X, mask):
    """Full SparseSelfAttention forward (attn_type='softmax', topk=1, eval)."""
    B, S, D = X.shape
    wqkv, wo, bias = packed
    # --- routing glue (plain JAX): switch Linear + softmax + top-1 expert pick ---
    logits = X.reshape(B, -1) @ params["switch_w"].T + params["switch_b"]
    route_prob = jax.nn.softmax(logits, axis=-1)
    expert_idx = jnp.argmax(route_prob, axis=-1).astype(jnp.int32)   # (B,)
    # hot path (projections + attention + output proj) runs in the Pallas kernel
    return sparse_self_attention_pallas(X.astype(jnp.bfloat16), expert_idx, wqkv, wo, bias)


def sparse_self_attention_reference(params, X, mask):
    """Pure-JAX f32 reference for correctness checking."""
    B, S, D = X.shape
    logits = X.reshape(B, -1) @ params["switch_w"].T + params["switch_b"]
    route_prob = jax.nn.softmax(logits, axis=-1)
    expert_idx = jnp.argmax(route_prob, axis=-1)

    def per_batch(xb, e):
        q = xb @ params["wq"][e] + params["bq"][e]
        k = xb @ params["wk"][e] + params["bk"][e]
        v = xb @ params["wv"][e] + params["bv"][e]
        s = (q @ k.T) / math.sqrt(D)
        p = jax.nn.softmax(s, axis=-1)
        return (p @ v) @ params["wo"][e] + params["bo"][e]

    return jax.vmap(per_batch)(X, expert_idx)


# --------------------------------- main --------------------------------------
if __name__ == "__main__":
    # config-equivalent hyperparameters
    B = 2            # config.batch_size
    S = 128          # config.max_seq_len
    D = 128          # config.transformer_dim
    num_heads = 4    # config.num_heads
    head_dim = 32    # config.head_dim  (num_heads * head_dim == D)
    expert_dim = 64  # config.expert_dim  (auto_group -> n_experts = D // expert_dim)
    n_experts = D // expert_dim
    # attn_topk = 1, attn_type = 'softmax', attention_dropout = 0.0 (eval)

    key = jax.random.PRNGKey(0)
    k_param, k_x = jax.random.split(key)
    params = init_params(k_param, d_model=D, seq_len=S, n_experts=n_experts)
    packed = pack_expert_params(params)

    X = jax.random.normal(k_x, (B, S, D), jnp.float32)
    mask = jnp.ones((B, S), jnp.float32)   # accepted but unused (matches PyTorch path)

    out = sparse_self_attention_forward(params, packed, X, mask)
    out = jax.block_until_ready(out)

    ref = jax.block_until_ready(sparse_self_attention_reference(params, X, mask))
    # bf16 matmul inputs w/ f32 accumulation vs f32 reference
    np.testing.assert_allclose(np.asarray(out), np.asarray(ref), rtol=1e-2, atol=2e-3)

    print("KERNEL_OK")
</pallas_src>

<mosaic_0001>
module attributes {stable_mosaic.version = 11 : i64} {
  func.func @_sparse_attn_kernel(%arg0: i32, %arg1: memref<2xi32, #tpu.memory_space<smem>>, %arg2: memref<1x128x128xbf16, #tpu.memory_space<vmem>>, %arg3: memref<1x128x384xbf16, #tpu.memory_space<vmem>>, %arg4: memref<1x128x128xbf16, #tpu.memory_space<vmem>>, %arg5: memref<1x4x128xf32, #tpu.memory_space<vmem>>, %arg6: memref<1x128x128xf32, #tpu.memory_space<vmem>>) attributes {dimension_semantics = [#tpu.dimension_semantics<parallel>], iteration_bounds = array<i64: 2>, scalar_prefetch = 1 : i64, scratch_operands = 0 : i64, tpu.core_type = #tpu.core_type<tc>, window_params = [{transform_indices = @transform_0, window_bounds = array<i64: 1, 128, 128>}, {transform_indices = @transform_1, window_bounds = array<i64: 1, 128, 384>}, {transform_indices = @transform_2, window_bounds = array<i64: 1, 128, 128>}, {transform_indices = @transform_3, window_bounds = array<i64: 1, 4, 128>}, {transform_indices = @transform_4, window_bounds = array<i64: 1, 128, 128>}]} {
    %c0 = arith.constant 0 : index
    %c0_0 = arith.constant 0 : index
    %c0_1 = arith.constant 0 : index
    %0 = vector.load %arg2[%c0, %c0_0, %c0_1] : memref<1x128x128xbf16, #tpu.memory_space<vmem>>, vector<1x128x128xbf16>
    %1 = vector.shape_cast %0 : vector<1x128x128xbf16> to vector<128x128xbf16>
    %c0_2 = arith.constant 0 : index
    %c0_3 = arith.constant 0 : index
    %c0_4 = arith.constant 0 : index
    %2 = vector.load %arg5[%c0_2, %c0_3, %c0_4] : memref<1x4x128xf32, #tpu.memory_space<vmem>>, vector<1x4x128xf32>
    %3 = vector.shape_cast %2 : vector<1x4x128xf32> to vector<4x128xf32>
    %c0_5 = arith.constant 0 : index
    %c0_6 = arith.constant 0 : index
    %c0_7 = arith.constant 0 : index
    %4 = vector.load %arg3[%c0_5, %c0_6, %c0_7] : memref<1x128x384xbf16, #tpu.memory_space<vmem>>, vector<1x128x384xbf16>
    %5 = vector.shape_cast %4 : vector<1x128x384xbf16> to vector<128x384xbf16>
    %cst = arith.constant dense<0.000000e+00> : vector<128x384xf32>
    %6 = tpu.matmul %1, %5, %cst {dimension_numbers = #tpu.dot_dimension_numbers<[1], [0], [0], [1], [0, 0, 1, 1], [], []>} : vector<128x128xbf16>, vector<128x384xbf16>, vector<128x384xf32> -> vector<128x384xf32>
    %7 = vector.extract_strided_slice %6 {offsets = [0, 0], sizes = [128, 128], strides = [1, 1]} : vector<128x384xf32> to vector<128x128xf32>
    %8 = vector.extract_strided_slice %3 {offsets = [0, 0], sizes = [1, 128], strides = [1, 1]} : vector<4x128xf32> to vector<1x128xf32>
    %9 = vector.broadcast %8 : vector<1x128xf32> to vector<128x128xf32>
    %10 = arith.addf %7, %9 : vector<128x128xf32>
    %cst_8 = arith.constant 0.0883883461 : f32
    %11 = vector.broadcast %cst_8 : f32 to vector<128x128xf32>
    %12 = arith.mulf %10, %11 : vector<128x128xf32>
    %13 = vector.extract_strided_slice %6 {offsets = [0, 128], sizes = [128, 128], strides = [1, 1]} : vector<128x384xf32> to vector<128x128xf32>
    %14 = vector.extract_strided_slice %3 {offsets = [1, 0], sizes = [1, 128], strides = [1, 1]} : vector<4x128xf32> to vector<1x128xf32>
    %15 = vector.broadcast %14 : vector<1x128xf32> to vector<128x128xf32>
    %16 = arith.addf %13, %15 : vector<128x128xf32>
    %17 = vector.extract_strided_slice %6 {offsets = [0, 256], sizes = [128, 128], strides = [1, 1]} : vector<128x384xf32> to vector<128x128xf32>
    %18 = vector.extract_strided_slice %3 {offsets = [2, 0], sizes = [1, 128], strides = [1, 1]} : vector<4x128xf32> to vector<1x128xf32>
    %19 = vector.broadcast %18 : vector<1x128xf32> to vector<128x128xf32>
    %20 = arith.addf %17, %19 : vector<128x128xf32>
    %21 = arith.truncf %12 : vector<128x128xf32> to vector<128x128xbf16>
    %22 = arith.truncf %16 : vector<128x128xf32> to vector<128x128xbf16>
    %cst_9 = arith.constant dense<0.000000e+00> : vector<128x128xf32>
    %23 = tpu.matmul %21, %22, %cst_9 {dimension_numbers = #tpu.dot_dimension_numbers<[1], [1], [0], [0], [0, 0, 1, 0], [], []>} : vector<128x128xbf16>, vector<128x128xbf16>, vector<128x128xf32> -> vector<128x128xf32>
    %cst_10 = arith.constant dense<0xFF800000> : vector<128xf32>
    %24 = vector.multi_reduction <maximumf>, %23, %cst_10 [1] : vector<128x128xf32> to vector<128xf32>
    %25 = vector.shape_cast %24 : vector<128xf32> to vector<128x1xf32>
    %26 = vector.broadcast %25 : vector<128x1xf32> to vector<128x128xf32>
    %27 = arith.subf %23, %26 : vector<128x128xf32>
    %28 = math.exp %27 : vector<128x128xf32>
    %cst_11 = arith.constant dense<0.000000e+00> : vector<128xf32>
    %29 = vector.multi_reduction <add>, %28, %cst_11 [1] : vector<128x128xf32> to vector<128xf32>
    %30 = vector.shape_cast %29 : vector<128xf32> to vector<128x1xf32>
    %31 = tpu.reciprocal %30 {approx = true} : vector<128x1xf32> -> vector<128x1xf32>
    %32 = vector.broadcast %31 : vector<128x1xf32> to vector<128x128xf32>
    %33 = arith.mulf %28, %32 : vector<128x128xf32>
    %34 = arith.truncf %33 : vector<128x128xf32> to vector<128x128xbf16>
    %35 = arith.truncf %20 : vector<128x128xf32> to vector<128x128xbf16>
    %cst_12 = arith.constant dense<0.000000e+00> : vector<128x128xf32>
    %36 = tpu.matmul %34, %35, %cst_12 {dimension_numbers = #tpu.dot_dimension_numbers<[1], [0], [0], [1], [0, 0, 1, 1], [], []>} : vector<128x128xbf16>, vector<128x128xbf16>, vector<128x128xf32> -> vector<128x128xf32>
    %37 = arith.truncf %36 : vector<128x128xf32> to vector<128x128xbf16>
    %c0_13 = arith.constant 0 : index
    %c0_14 = arith.constant 0 : index
    %c0_15 = arith.constant 0 : index
    %38 = vector.load %arg4[%c0_13, %c0_14, %c0_15] : memref<1x128x128xbf16, #tpu.memory_space<vmem>>, vector<1x128x128xbf16>
    %39 = vector.shape_cast %38 : vector<1x128x128xbf16> to vector<128x128xbf16>
    %cst_16 = arith.constant dense<0.000000e+00> : vector<128x128xf32>
    %40 = tpu.matmul %37, %39, %cst_16 {dimension_numbers = #tpu.dot_dimension_numbers<[1], [0], [0], [1], [0, 0, 1, 1], [], []>} : vector<128x128xbf16>, vector<128x128xbf16>, vector<128x128xf32> -> vector<128x128xf32>
    %41 = vector.extract_strided_slice %3 {offsets = [3, 0], sizes = [1, 128], strides = [1, 1]} : vector<4x128xf32> to vector<1x128xf32>
    %42 = vector.broadcast %41 : vector<1x128xf32> to vector<128x128xf32>
    %43 = arith.addf %40, %42 : vector<128x128xf32>
    %c0_17 = arith.constant 0 : index
    %c0_18 = arith.constant 0 : index
    %c0_19 = arith.constant 0 : index
    %44 = vector.load %arg6[%c0_17, %c0_18, %c0_19] : memref<1x128x128xf32, #tpu.memory_space<vmem>>, vector<1x128x128xf32>
    %45 = vector.shape_cast %44 : vector<1x128x128xf32> to vector<128x128xf32>
    %46 = vector.shape_cast %43 : vector<128x128xf32> to vector<1x128x128xf32>
    tpu.vector_store %arg6[%c0_17, %c0_18, %c0_19], %46 {strides = array<i32>} : memref<1x128x128xf32, #tpu.memory_space<vmem>>, vector<1x128x128xf32>,
    return
  }
  func.func @transform_0(%arg0: i32, %arg1: memref<2xi32, #tpu.memory_space<smem>>) -> (i32, i32, i32) {
    %c0_i32 = arith.constant 0 : i32
    %c0_i32_0 = arith.constant 0 : i32
    %c0_i32_1 = arith.constant 0 : i32
    return %arg0, %c0_i32, %c0_i32_0 : i32, i32, i32
  }
  func.func @transform_1(%arg0: i32, %arg1: memref<2xi32, #tpu.memory_space<smem>>) -> (i32, i32, i32) {
    %0 = arith.index_cast %arg0 : i32 to index
    %1 = memref.load %arg1[%0] : memref<2xi32, #tpu.memory_space<smem>>
    %c0_i32 = arith.constant 0 : i32
    %c0_i32_0 = arith.constant 0 : i32
    %c0_i32_1 = arith.constant 0 : i32
    return %1, %c0_i32, %c0_i32_0 : i32, i32, i32
  }
  func.func @transform_2(%arg0: i32, %arg1: memref<2xi32, #tpu.memory_space<smem>>) -> (i32, i32, i32) {
    %0 = arith.index_cast %arg0 : i32 to index
    %1 = memref.load %arg1[%0] : memref<2xi32, #tpu.memory_space<smem>>
    %c0_i32 = arith.constant 0 : i32
    %c0_i32_0 = arith.constant 0 : i32
    %c0_i32_1 = arith.constant 0 : i32
    return %1, %c0_i32, %c0_i32_0 : i32, i32, i32
  }
  func.func @transform_3(%arg0: i32, %arg1: memref<2xi32, #tpu.memory_space<smem>>) -> (i32, i32, i32) {
    %0 = arith.index_cast %arg0 : i32 to index
    %1 = memref.load %arg1[%0] : memref<2xi32, #tpu.memory_space<smem>>
    %c0_i32 = arith.constant 0 : i32
    %c0_i32_0 = arith.constant 0 : i32
    %c0_i32_1 = arith.constant 0 : i32
    return %1, %c0_i32, %c0_i32_0 : i32, i32, i32
  }
  func.func @transform_4(%arg0: i32, %arg1: memref<2xi32, #tpu.memory_space<smem>>) -> (i32, i32, i32) {
    %c0_i32 = arith.constant 0 : i32
    %c0_i32_0 = arith.constant 0 : i32
    %c0_i32_1 = arith.constant 0 : i32
    return %arg0, %c0_i32, %c0_i32_0 : i32, i32, i32
  }
}

</mosaic_0001>

<bundles_post_ra>
// kernel: tpu_custom_call.1
= control target key start
LH: loop header
LB: loop body
LE: loop exit
PB: predicated region body
PF: predicated region fallthrough
CT: control target
= control target key end

     0   :  { %s2984_s0 = inlined_call_operand.hbm [shape: s32[2], index: 0, kind: input, shape index: {}]   ;;  %s2985_s1 = inlined_call_operand.hbm [shape: bf16[2,128,128], index: 1, kind: input, shape index: {}]   ;;  %s2986_s2 = inlined_call_operand.hbm [shape: bf16[2,128,384], index: 2, kind: input, shape index: {}]   ;;  %s2987_s3 = inlined_call_operand.hbm [shape: bf16[2,128,128], index: 3, kind: input, shape index: {}]   ;;  %s2988_s4 = inlined_call_operand.vmem [shape: f32[2,4,128], index: 4, kind: input, shape index: {}]   ;;  %s2989_s5 = inlined_call_operand.hbm [shape: f32[2,128,128], index: 5, kind: output, shape index: {}]  }
   0x1   :  { %3000 = sst [smem:[#allocation24_spill]] %s2985_s1  ;;  %s2033_s20 = scalar_lea.hbm %s2984_s0, 16 }
   0x2   :  { %3001 = sst [smem:[#allocation25_spill]] %s2986_s2  ;;  %p2034_p0 = scmp.ne.s32.totalorder %s2984_s0, %s2033_s20 }
   0x3   :  { %p2037_p1 = scmp.lt.u32.totalorder %s2033_s20, %s2984_s0 }
   0x5   :  { %p2039_p2 = pnand %p2037_p1, %p2034_p0 }
   0x7   :  { %2042 = shalt.err (!%p2039_p2)  }
   0x8   :  { %s2259_s25 = smov [#allocation3]  }
   0x9   :  { %11 = dma.hbm_to_smem %s2984_s0, 16, %s2259_s25, [#allocation2] }
   0xa   :  { %2201 = dma.done.wait [#allocation2], 16 }
   0xb   :  { %2202 = vsyncadd [#allocation2], 4294967280 }
   0xc   :  { %13 = sfence }
   0xd   :  { %14 = vsyncpa [#allocation5], 0 }
   0xe   :  { %16 = vsyncpa [#allocation5 + $0x1], 0 }
   0xf   :  { %17 = vsyncpa [#allocation8], 0 }
  0x10   :  { %19 = vsyncpa [#allocation8 + $0x1], 0 }
  0x11   :  { %20 = vsyncpa [#allocation6], 0 }
  0x12   :  { %22 = vsyncpa [#allocation6 + $0x1], 0  ;;  %s2313_s28 = smov 0   ;;  %s2315_s29 = smov 0  }
  0x13   :  { %s2317_s30 = smov 0   ;;  %s2319_s6 = smov 0  }
  0x14   :  { %s2321_s7 = smov 0   ;;  %s2323_s0 = smov 0  }
  0x15   :  { %s2325_s8 = smov 0   ;;  %s2327_s9 = smov 0  }
  0x16   :  { %s2329_s10 = smov 0   ;;  %s2331_s11 = smov 0  }
  0x17 LB: > { %3002 = sst [smem:[#allocation20_spill]] %s2241_s0  ;;  %s2362_s12 = sadd.s32 4294967295, %s2257_s11   ;;  %s2257_s11 = sphi %s2331_s11, %s3047_s11   ;;  %s2253_s10 = sphi %s2329_s10, %s3039_s10   ;;  %s2249_s9 = sphi %s2327_s9, %s3046_s9   ;;  %s2245_s8 = sphi %s2325_s8, %s3045_s8   ;;  %s2241_s0 = sphi %s2323_s0, %s3037_s0   ;;  %s2237_s7 = sphi %s2321_s7, %s3044_s7   ;;  %s2233_s6 = sphi %s2319_s6, %s3043_s6   ;;  %s2229_s30 = sphi %s2317_s30, %s3042_s30   ;;  %s2225_s29 = sphi %s2315_s29, %s3041_s29   ;;  %s2221_s28 = sphi %s2313_s28, %s3040_s28  }
  0x18   : > { %3003 = sst [smem:[#allocation21_spill]] %s2253_s10  ;;  %s2365_s13 = sadd.s32 1, %s2257_s11  }
  0x19   : > { %p2993_p3 = scmp.eq.s32.totalorder %s2257_s11, 0  ;;  %p2992_p4 = scmp.eq.s32.totalorder %s2362_s12, 0 }
  0x1a   : > { %s58_s14 = sld [smem:[#allocation3 + %s2257_s11]]  ;;  %s63_s16 = sadd.s32 1, %s2241_s0 }
  0x1b   : > { %s59_s15 = sld [smem:[#allocation3 + %s2365_s13]]  ;;  %p70_p5 = scmp.ne.s32.totalorder %s2241_s0, %s2237_s7 }
  0x1c   : > { %p76_p6 = scmp.ne.s32.totalorder %s2237_s7, %s2233_s6  ;;  %p2991_p9 = scmp.lt.s32.totalorder %s2257_s11, 2 }
  0x1d   : > { %p2378_p8 = por %p70_p5, %p2993_p3  ;;  %s203_s19 = sand.u32 1, %s2257_s11  }
  0x1e   : > { %p2385_p10 = por %p76_p6, %p2992_p4  ;;  %s205_s20 = sand.u32 1, %s2241_s0  }
  0x1f   : > { %s1798_s22 = smul.u32 192, %s205_s20  ;;  %p2395_p12 = pnand %p2991_p9, %p2378_p8 }
  0x20   : > { %s3005_s18 = scalar_select %p2385_p10, 1, 0 }
  0x21   : > { %s60_s21 = ssub.s32 %s58_s14, %s59_s15  ;;  %s207_s27 = scalar_lea.vmem [#allocation7], %s1798_s22 }
  0x22   : > { %p61_p11 = scmp.eq.s32.totalorder %s60_s21, 0  ;;  %s215_s6 = sshll.u32 %s207_s27, 4  ;;  %s2411_s6 = int_to_ptr.vmem [resolvable:$true] %s215_s6 }
  0x23   : > { %s1802_s25 = scalar_select %p2378_p8, [#allocation3], [#allocation11] }
  0x24   : > { %s2400_s24 = scalar_select %p61_p11, %s2241_s0, %s63_s16  }
  0x25   : > { %s1803_s26 = scalar_select %p2378_p8, %s2257_s11, 0 }
  0x26   : > { %3007 = sst [smem:[#allocation22_spill]] %s2400_s24  ;;  %s3049_s25 = smov (!%p2991_p9, %s1802_s25), [#allocation13] }
  0x27   : > { %s3051_s26 = smov (!%p2991_p9, %s1803_s26), 0  ;;  %p1553_p13 = scmp.ge.s32.totalorder %s2257_s11, 1 }
  0x28   : > { %s208_s14 = sld [smem:[%s3049_s25 + %s3051_s26]]  ;;  %p254_p0 = scmp.lt.s32.totalorder %s2257_s11, 3 }
  0x29   : > { %s32_s20 = ssub.s32 %s2257_s11, %s2365_s13  ;;  %s35_s21 = sadd.s32 1, %s2253_s10 }
  0x2a   : > { %p2415_p1 = pnand %p1553_p13, %p254_p0  ;;  %s3009_s2 = sld [smem:[#allocation25_spill]] }
  0x2b   : > { %p2428_p2 = scmp.eq.s32.totalorder %s32_s20, 0  ;;  %s2432_s26 = scalar_lea.sflag [#allocation8], %s203_s19 }
  0x2c   : > { %s3008_s15 = scalar_select %p2415_p1, 1, 0 }
  0x2d   : > { %p2045_p6 = pneg %p2395_p12 }
  0x2e   : > { %s1799_s16 = smul.u32 3072, %s208_s14 }
  0x30   : > { %s2426_s22 = scalar_lea.hbm %s3009_s2, %s1799_s16  ;;  %s2048_s14 = scalar_lea.hbm %s3009_s2, 6144 }
  0x31   : > { %s2043_s27 = scalar_lea.hbm %s2426_s22, 3072  ;;  %p2049_p13 = scmp.lt.u32.totalorder %s2426_s22, %s3009_s2 }
  0x32   : > { %p2044_p5 = scmp.ne.s32.totalorder %s2426_s22, %s2043_s27  ;;  %p2050_p0 = scmp.lt.u32.totalorder %s2048_s14, %s2043_s27 }
  0x33   : > { %p2052_p9 = scmp.lt.u32.totalorder %s2043_s27, %s2426_s22 }
  0x34   : > { %p2046_p8 = pnand %p2045_p6, %p2044_p5  ;;  %p2051_p7 = por %p2050_p0, %p2049_p13 }
  0x36   : > { %p2047_p11 = pneg %p2046_p8  ;;  %p2053_p4 = por %p2052_p9, %p2051_p7 }
  0x38   : > { %p2054_p3 = pnand %p2053_p4, %p2047_p11 }
  0x3a   : > { %2057 = shalt.err (!%p2054_p3)
}
  0x3b   : > { %s2058_s19 = scalar_lea.vmem %s2411_s6, 3072  ;;  %s2260_s20 = smov [#allocation7]  }
  0x3c   : > { %p2059_p5 = scmp.ne.s32.totalorder %s2411_s6, %s2058_s19  ;;  %s2063_s0 = sshll.u32 %s2260_s20, 4  ;;  %s2064_s0 = int_to_ptr.vmem [resolvable:$false] %s2063_s0 }
  0x3d   : > { %s2065_s17 = scalar_lea.vmem %s2064_s0, 6144  ;;  %p2066_p1 = scmp.lt.s32.totalorder %s2411_s6, %s2064_s0 }
  0x3e   : > { %p2061_p8 = pnand %p2059_p5, %p2045_p6  ;;  %p2067_p13 = scmp.lt.s32.totalorder %s2065_s17, %s2058_s19 }
  0x40   : > { %p2062_p10 = pneg %p2061_p8  ;;  %p2068_p0 = por %p2067_p13, %p2066_p1 }
  0x42   : > { %p2069_p7 = pnand %p2068_p0, %p2062_p10 }
  0x44   : > { %2072 = shalt.err (!%p2069_p7)
}
  0x45   : > { %s2261_s27 = smov 192   ;;  %s2262_s24 = smov 12  }
  0x46   : > { %1821 = dma.hbm_to_vmem [thread:$0]  (!%p2395_p12), %s2426_s22, 3072, %s2411_s6, %s2432_s26, %s2261_s27, %s2261_s27, %s2262_s24  }
  0x47   : > { %s2465_s14 = scalar_select %p2428_p2, %s2253_s10, %s35_s21  }
  0x48   : > { %p42_p3 = scmp.ne.s32.totalorder %s2253_s10, %s2249_s9  ;;  %p48_p4 = scmp.ne.s32.totalorder %s2249_s9, %s2245_s8 }
  0x49   : > { %3011 = sst [smem:[#allocation23_spill]] %s2465_s14  ;;  %p156_p9 = scmp.eq.s32.totalorder %s2362_s12, 1 }
  0x4a   : > { %s3012_s16 = sadd.s32 4294967294, %s2257_s11   ;;  %p3013_p1 = scmp.eq.s32.totalorder %s2257_s11, 0 }
  0x4b   : > { %p162_p10 = scmp.eq.s32.totalorder %s3012_s16, 1  ;;  %p3014_p11 = scmp.eq.s32.totalorder %s2362_s12, 0 }
  0x4c   : > { %p44_p6 = por %p3013_p1, %p42_p3  ;;  %p2482_p8 = por %p156_p9, %p42_p3 }
  0x4d   : > { %p2478_p5 = por %p3014_p11, %p48_p4  ;;  %p2486_p12 = por %p162_p10, %p48_p4 }
  0x4e   : > { %s3016_s23 = scalar_select %p2482_p8, 1, 0 }
  0x4f   : > { %s3017_s6 = scalar_select %p2486_p12, 1, 0 }
  0x50   : > { %s182_s21 = sand.u32 1, %s2253_s10   ;;  %s1603_s22 = sshll.u32 %s2257_s11, 10 }
  0x51   : > { %s1546_s25 = sshll.u32 %s182_s21, 6  ;;  %s3018_s1 = sld [smem:[#allocation24_spill]] }
  0x52   : > { %s186_s27 = scalar_lea.vmem [#allocation4], %s1546_s25  ;;  %p3019_p2 = scmp.lt.s32.totalorder %s2257_s11, 2 }
  0x53   : > { %s193_s24 = sshll.u32 %s186_s27, 4  ;;  %s2505_s2 = scalar_lea.sflag [#allocation5], %s182_s21  ;;  %s2503_s24 = int_to_ptr.vmem [resolvable:$true] %s193_s24 }
  0x54   : > { %p2499_p13 = pnand %p3019_p2, %p44_p6 }
  0x56   : > { %p2075_p7 = pneg %p2499_p13 }
  0x57   : > { %s2495_s17 = scalar_lea.hbm %s3018_s1, %s1603_s22  ;;  %s2078_s0 = scalar_lea.hbm %s3018_s1, 2048 }
  0x58   : > { %s2073_s20 = scalar_lea.hbm %s2495_s17, 1024  ;;  %p2079_p9 = scmp.lt.u32.totalorder %s2495_s17, %s3018_s1 }
  0x59   : > { %p2074_p0 = scmp.ne.s32.totalorder %s2495_s17, %s2073_s20  ;;  %p2080_p10 = scmp.lt.u32.totalorder %s2078_s0, %s2073_s20 }
  0x5a   : > { %p2082_p6 = scmp.lt.u32.totalorder %s2073_s20, %s2495_s17 }
  0x5b   : > { %p2076_p3 = pnand %p2075_p7, %p2074_p0  ;;  %p2081_p1 = por %p2080_p10, %p2079_p9 }
  0x5d   : > { %p2077_p4 = pneg %p2076_p3  ;;  %p2083_p11 = por %p2082_p6, %p2081_p1 }
  0x5f   : > { %p2084_p2 = pnand %p2083_p11, %p2077_p4 }
  0x61   : > { %2087 = shalt.err (!%p2084_p2)
}
  0x62   : > { %s2088_s21 = scalar_lea.vmem %s2503_s24, 1024  ;;  %s2263_s22 = smov [#allocation4]  }
  0x63   : > { %p2089_p0 = scmp.ne.s32.totalorder %s2503_s24, %s2088_s21  ;;  %s2093_s25 = sshll.u32 %s2263_s22, 4  ;;  %s2094_s25 = int_to_ptr.vmem [resolvable:$false] %s2093_s25 }
  0x64   : > { %s2095_s14 = scalar_lea.vmem %s2094_s25, 2048  ;;  %p2096_p8 = scmp.lt.s32.totalorder %s2503_s24, %s2094_s25 }
  0x65   : > { %p2091_p3 = pnand %p2089_p0, %p2075_p7  ;;  %p2097_p9 = scmp.lt.s32.totalorder %s2095_s14, %s2088_s21 }
  0x67   : > { %p2092_p12 = pneg %p2091_p3  ;;  %p2098_p10 = por %p2097_p9, %p2096_p8 }
  0x69   : > { %p2099_p1 = pnand %p2098_p10, %p2092_p12 }
  0x6b   : > { %2102 = shalt.err (!%p2099_p1)
}
  0x6c   : > { %s2997_s20 = smov 64   ;;  %s2998_s0 = smov 4  }
  0x6d   : > { %1816 = dma.hbm_to_vmem [thread:$0]  (!%p2499_p13), %s2495_s17, 1024, %s2503_s24, %s2505_s2, %s2997_s20, %s2997_s20, %s2998_s0  }
  0x6e   : > { %s86_s27 = sld [smem:[#allocation3 + %s2257_s11]]  ;;  %p98_p8 = scmp.ne.s32.totalorder %s2229_s30, %s2225_s29 }
  0x6f   : > { %s87_s21 = sld [smem:[#allocation3 + %s2365_s13]]  ;;  %p104_p12 = scmp.ne.s32.totalorder %s2225_s29, %s2221_s28 }
  0x70   : > { %p3021_p7 = scmp.eq.s32.totalorder %s2257_s11, 0  ;;  %p3022_p6 = scmp.eq.s32.totalorder %s2362_s12, 0 }
  0x71   : > { %s227_s25 = sand.u32 1, %s2229_s30   ;;  %s91_s1 = sadd.s32 1, %s2229_s30 }
  0x72   : > { %p100_p4 = por %p98_p8, %p3021_p7  ;;  %p2546_p11 = por %p104_p12, %p3022_p6 }
  0x73   : > { %s1550_s10 = sshll.u32 %s227_s25, 6  ;;  %p3024_p13 = scmp.lt.s32.totalorder %s2257_s11, 2 }
  0x74   : > { %s3023_s22 = scalar_select %p2546_p11, 1, 0 }
  0x75   : > { %s1805_s16 = scalar_select %p100_p4, [#allocation3], [#allocation12] }
  0x76   : > { %s88_s14 = ssub.s32 %s86_s27, %s87_s21  ;;  %p3025_p0 = pmov %p3024_p13 }
  0x77   : > { %p89_p2 = scmp.eq.s32.totalorder %s88_s14, 0  ;;  %s3053_s16 = smov (!%p3024_p13, %s1805_s16), [#allocation14] }
  0x78   : > { %s1806_s2 = scalar_select %p100_p4, %s2257_s11, 0 }
  0x79   : > { %s2554_s17 = scalar_select %p89_p2, %s2229_s30, %s91_s1  }
  0x7a   : > { %s3055_s2 = smov (!%p3025_p0, %s1806_s2), 0  ;;  %p3026_p3 = pmov %p3025_p0 }
  0x7b   : > { %s230_s24 = sld [smem:[%s3053_s16 + %s3055_s2]]  ;;  %s229_s20 = scalar_lea.vmem [#allocation9], %s1550_s10 }
  0x7c   : > { %p2562_p9 = pnand %p3026_p3, %p100_p4  ;;  %s237_s27 = sshll.u32 %s229_s20, 4  ;;  %s2566_s27 = int_to_ptr.vmem [resolvable:$true] %s237_s27 }
  0x7d   : > { %s2108_s16 = scalar_lea.hbm %s2987_s3, 2048 }
  0x7e   : > { %p2105_p1 = pneg %p2562_p9 }
  0x81   : > { %s1604_s21 = sshll.u32 %s230_s24, 10 }
  0x82   : > { %s2571_s14 = scalar_lea.hbm %s2987_s3, %s1604_s21 }
  0x83   : > { %s2103_s0 = scalar_lea.hbm %s2571_s14, 1024  ;;  %p2109_p7 = scmp.lt.u32.totalorder %s2571_s14, %s2987_s3 }
  0x84   : > { %p2104_p10 = scmp.ne.s32.totalorder %s2571_s14, %s2103_s0  ;;  %p2110_p4 = scmp.lt.u32.totalorder %s2108_s16, %s2103_s0 }
  0x85   : > { %p2112_p2 = scmp.lt.u32.totalorder %s2103_s0, %s2571_s14 }
  0x86   : > { %p2106_p8 = pnand %p2105_p1, %p2104_p10  ;;  %p2111_p6 = por %p2110_p4, %p2109_p7 }
  0x88   : > { %p2107_p12 = pneg %p2106_p8  ;;  %p2113_p13 = por %p2112_p2, %p2111_p6 }
  0x8a   : > { %p2114_p0 = pnand %p2113_p13, %p2107_p12 }
  0x8c   : > { %2117 = shalt.err (!%p2114_p0)
}
  0x8d   : > { %s2118_s21 = scalar_lea.vmem %s2566_s27, 1024  ;;  %s2266_s25 = smov [#allocation9]  }
  0x8e   : > { %p2119_p3 = scmp.ne.s32.totalorder %s2566_s27, %s2118_s21  ;;  %s2123_s1 = sshll.u32 %s2266_s25, 4  ;;  %s2124_s1 = int_to_ptr.vmem [resolvable:$false] %s2123_s1 }
  0x8f   : > { %s2125_s10 = scalar_lea.vmem %s2124_s1, 2048  ;;  %p2126_p11 = scmp.lt.s32.totalorder %s2566_s27, %s2124_s1 }
  0x90   : > { %p2121_p10 = pnand %p2119_p3, %p2105_p1  ;;  %p2127_p7 = scmp.lt.s32.totalorder %s2125_s10, %s2118_s21 }
  0x92   : > { %p2122_p8 = pneg %p2121_p10  ;;  %p2128_p4 = por %p2127_p7, %p2126_p11 }
  0x94   : > { %p2129_p6 = pnand %p2128_p4, %p2122_p8 }
  0x96   : > { %2132 = shalt.err (!%p2129_p6)
}
  0x97   : > { %s3028_s0 = smov 4   ;;  %s3029_s20 = smov 64  }
  0x98   : > { %1826 = dma.hbm_to_vmem [thread:$0]  (!%p2562_p9), %s2571_s14, 1024, %s2566_s27, %s2432_s26, %s3029_s20, %s3029_s20, %s3028_s0  }
  0x99   : > { %p3030_p1 = scmp.ne.s32.totalorder %s3008_s15, 0 }
  0x9a   : > { %s2605_s16 = sand.u32 (!%p3030_p1), 1, %s2249_s9  }
  0x9b   : > { %258 = sbr.rel (%p3030_p1) target bundleno = 1497 (0x5d9), region = 36  ;;  %s1554_s2 = sshll.u32 (!%p3030_p1), %s2605_s16, 6 }
  0x9c   : > { %s261_s24 = scalar_lea.sflag (!%p3030_p1), [#allocation5], %s2605_s16  ;;  %s2609_s21 = scalar_lea.vmem (!%p3030_p1), [#allocation4], %s1554_s2 }
  0xa2   : > { %2204 = dma.done.wait (%p2478_p5), %s261_s24, 1024  }
  0xa3   : > { %2206 = vsyncadd (%p2478_p5), %s261_s24, 4294966272  ;;  %s269_s15 = sand.u32 1, %s2362_s12   ;;  %s271_s26 = sand.u32 1, %s2237_s7  }
  0xa4   : > { %s1800_s28 = smul.u32 192, %s271_s26  ;;  %s270_s27 = scalar_lea.sflag [#allocation8], %s269_s15 }
  0xa5   : > { %p3031_p11 = scmp.ne.s32.totalorder %s3005_s18, 0 }
  0xa6   : > { %s2617_s14 = scalar_lea.vmem [#allocation7], %s1800_s28 }
  0xa7   : > { %2208 = dma.done.wait (%p3031_p11), %s270_s27, 3072  }
  0xa8   : > { %2210 = vsyncadd (%p3031_p11), %s270_s27, 4294964224  ;;  %s280_s25 = sand.u32 1, %s2225_s29   ;;  %p3032_p5 = scmp.ne.s32.totalorder %s3023_s22, 0 }
  0xa9   : > { %s1555_s1 = sshll.u32 %s280_s25, 6 }
  0xaa   : > { %s2624_s19 = scalar_lea.vmem [#allocation9], %s1555_s1 }
  0xab   : > { %2212 = dma.done.wait (%p3032_p5), %s270_s27, 1024  }
  0xac   : > { %2214 = vsyncadd (%p3032_p5), %s270_s27, 4294966272  ;;  %v2267_v0 = vmov 0   ;;  %v1921_v1 = vld [vmem:[%s2617_s14 + $0x4] ss:$12 sps:$4 sm:$0xff]   ;;  %v1923_v2 = vld [vmem:[%s2617_s14] ss:$12 sps:$4 sm:$0xff]   ;;  %v766_v25 = vlaneseq }
  0xad   : > { %588 = vmatprep.mubr.bf16.mxu0 %v2267_v0  ;;  %556 = vmatprep.subr.bf16.mxu0 %v1921_v1  ;;  %v1924_v3 = vld [vmem:[%s2617_s14 + $0x1c] ss:$12 sps:$4 sm:$0xff]   ;;  %v1926_v4 = vld [vmem:[%s2617_s14 + $0x18] ss:$12 sps:$4 sm:$0xff]   ;;  %v1927_v5 = vld [vmem:[%s2617_s14 + $0x34] ss:$12 sps:$4 sm:$0xff]  }
  0xae   : > { %557 = vmatpush1.bf16.msra.mxu0 %v1923_v2  ;;  %v1929_v6 = vld [vmem:[%s2617_s14 + $0x30] ss:$12 sps:$4 sm:$0xff]   ;;  %v1930_v7 = vld [vmem:[%s2617_s14 + $0x4c] ss:$12 sps:$4 sm:$0xff]   ;;  %v1932_v8 = vld [vmem:[%s2617_s14 + $0x48] ss:$12 sps:$4 sm:$0xff]  }
  0xaf   : > { %558 = vmatprep.subr.bf16.mxu0 %v1924_v3  ;;  %v1945_v9 = vld [vmem:[%s2609_s21] sm:$0xff]   ;;  %v1936_v12 = vld [vmem:[%s2617_s14 + $0x7c] ss:$12 sps:$4 sm:$0xff]   ;;  %v1942_v16 = vld [vmem:[%s2617_s14 + $0xac] ss:$12 sps:$4 sm:$0xff]   ;;  %s324_s18 = sld [smem:[#allocation3 + %s2362_s12]] }
  0xb0   : > { %v1933_v10 = vld [vmem:[%s2617_s14 + $0x64] ss:$12 sps:$4 sm:$0xff]   ;;  %1686 = vmatprep.mubr.bf16.mxu1 %v1945_v9  ;;  %v1935_v11 = vld [vmem:[%s2617_s14 + $0x60] ss:$12 sps:$4 sm:$0xff]   ;;  %v1944_v17 = vld [vmem:[%s2617_s14 + $0xa8] ss:$12 sps:$4 sm:$0xff]  }
  0xb1   : > { %v1938_v13 = vld [vmem:[%s2617_s14 + $0x78] ss:$12 sps:$4 sm:$0xff]   ;;  %v1939_v14 = vld [vmem:[%s2617_s14 + $0x94] ss:$12 sps:$4 sm:$0xff]   ;;  %v1941_v15 = vld [vmem:[%s2617_s14 + $0x90] ss:$12 sps:$4 sm:$0xff]  }
  0xb2   : > { %559 = vmatpush1.bf16.msra.mxu0 %v1926_v4  ;;  %v2648_v18 = vld [vmem:[%s2609_s21 + $0x8] sm:$0xff]   ;;  %v2652_v19 = vld [vmem:[%s2609_s21 + $0x10] sm:$0xff]   ;;  %v2656_v20 = vld [vmem:[%s2609_s21 + $0x18] sm:$0xff]   ;;  %v2676_v26 = vshrl.u32 %v766_v25, 7  ;;  %s1556_s2 = sshll.u32 %s2605_s16, 7  ;;  %p3033_p2 = scmp.ne.s32.totalorder %s3016_s23, 0 }
  0xb3   : > { %560 = vmatprep.subr.bf16.mxu0 %v1927_v5  ;;  %v2660_v21 = vld [vmem:[%s2609_s21 + $0x20] sm:$0xff]   ;;  %v2664_v22 = vld [vmem:[%s2609_s21 + $0x28] sm:$0xff]   ;;  %v2668_v23 = vld [vmem:[%s2609_s21 + $0x30] sm:$0xff]   ;;  %s2897_s24 = scalar_lea.vmem [#allocation10], %s1556_s2  ;;  %s2268_s25 = smov [#allocation10]  }
  0xb4   : > { %v2672_v24 = vld [vmem:[%s2609_s21 + $0x38] sm:$0xff]   ;;  %v768_v27 = vsub.s32 0, %v2676_v26  ;;  %v804_v29 = vsub.s32 1, %v2676_v26  ;;  %s1605_s21 = sshll.u32 %s2362_s12, 11  ;;  %s1415_s15 = sshll.u32 %s2897_s24, 4  ;;  %s2919_s15 = int_to_ptr.vmem [resolvable:$true] %s1415_s15 }
  0xb5   : > { %p325_p9 = scmp.lt.s32.totalorder %s324_s18, 1  ;;  %s2917_s27 = scalar_lea.hbm %s2989_s5, %s1605_s21 }
  0xb6   : > { %561 = vmatpush1.bf16.msra.mxu0 %v1929_v6  ;;  %s1402_s12 = scalar_lea.sflag [#allocation6], %s2605_s16  ;;  %s2137_s1 = sshll.u32 %s2268_s25, 4  ;;  %s2138_s1 = int_to_ptr.vmem [resolvable:$false] %s2137_s1 }
  0xb7   : > { %562 = vmatprep.subr.bf16.mxu0 %v1930_v7  ;;  %s3057_s18 = smov (!%p325_p9, %s324_s18), 1  ;;  %p2140_p3 = scmp.lt.s32.totalorder %s2919_s15, %s2138_s1 }
  0xb8   : > { %s1557_s22 = sshll.u32 %s3057_s18, 2 }
  0xb9   : > { %s328_s20 = scalar_lea.vmem %s2988_s4, %s1557_s22 }
  0xba   : > { %563 = vmatpush1.bf16.msra.mxu0 %v1932_v8  ;;  %v2682_v28 = vld [vmem:[%s328_s20] sm:$0xf] }
  0xbb   : > { %564 = vmatprep.subr.bf16.mxu0 %v1933_v10  ;;  %v2686_v30 = vrot.slane %v2682_v28, %v768_v27  ;;  %v2689_v32 = vrot.slane %v2682_v28, %v804_v29 }
  0xbe   : > { %565 = vmatpush1.bf16.msra.mxu0 %v1935_v11 }
  0xbf   : > { %566 = vmatprep.subr.bf16.mxu0 %v1936_v12 }
  0xc2   : > { %567 = vmatpush1.bf16.msra.mxu0 %v1938_v13 }
  0xc3   : > { %568 = vmatprep.subr.bf16.mxu0 %v1939_v14 }
  0xc6   : > { %569 = vmatpush1.bf16.msra.mxu0 %v1941_v15 }
  0xc7   : > { %570 = vmatprep.subr.bf16.mxu0 %v1942_v16 }
  0xca   : > { %571 = vmatpush1.bf16.msra.mxu0 %v1944_v17 }
  0xcd   : > { %589 = vmatmul.mubr.bf16.vlgmr.msra.gmra.mrb[0].mxu0 %v1945_v9 }
  0xce   : > { %598 = vmatprep.mubr.bf16.mxu0 %v2267_v0 }
  0xd5   : > { %599 = vmatmul.mubr.bf16.gmra.mrb[4].mxu0 %v2648_v18 }
  0xd6   : > { %608 = vmatprep.mubr.bf16.mxu0 %v2267_v0 }
  0xdd   : > { %609 = vmatmul.mubr.bf16.gmra.mrb[8].mxu0 %v2652_v19 }
  0xde   : > { %618 = vmatprep.mubr.bf16.mxu0 %v2267_v0 }
  0xe5   : > { %619 = vmatmul.mubr.bf16.gmra.mrb[12].mxu0 %v2656_v20 }
  0xe6   : > { %628 = vmatprep.mubr.bf16.mxu0 %v2267_v0 }
  0xed   : > { %629 = vmatmul.mubr.bf16.gmra.mrb[16].mxu0 %v2660_v21 }
  0xee   : > { %638 = vmatprep.mubr.bf16.mxu0 %v2267_v0 }
  0xf5   : > { %639 = vmatmul.mubr.bf16.gmra.mrb[20].mxu0 %v2664_v22 }
  0xf6   : > { %648 = vmatprep.mubr.bf16.mxu0 %v2267_v0 }
  0xfd   : > { %649 = vmatmul.mubr.bf16.gmra.mrb[24].mxu0 %v2668_v23 }
  0xfe   : > { %658 = vmatprep.mubr.bf16.mxu0 %v2267_v0 }
 0x105   : > { %659 = vmatmul.mubr.bf16.gmra.mrb[28].mxu0 %v2672_v24 }
 0x1a0   : > { %v590_v31 = vpop.f32.mrb[0].mxu0 }
 0x1a1   : > { %v770_v33 = vadd.f32 %v2686_v30, %v590_v31  ;;  %v592_v34 = vpop.f32.mrb[1].mxu0 }
 0x1a2   : > { %v594_v35 = vpop.f32.mrb[2].mxu0  ;;  %v806_v38 = vadd.f32 %v2689_v32, %v592_v34 }
 0x1a3   : > { %v771_v36 = vadd.f32 %v2686_v30, %v594_v35  ;;  %v596_v37 = vpop.f32.mrb[3].mxu0  ;;  %v786_v40 = vmul.f32 0.088388346, %v770_v33 }
 0x1a4   : > { %v807_v39 = vadd.f32 %v2689_v32, %v596_v37 }
 0x1a5   : > { %v787_v41 = vmul.f32 0.088388346, %v771_v36 }
 0x1a6   : > { %v850_v42 = vpack.c.bf16 %v807_v39, %v806_v38 }
 0x1a7   : > { %v842_v43 = vpack.c.bf16 %v787_v41, %v786_v40 }
 0x1a8   : > { %v600_v44 = vpop.f32.mrb[4].mxu0  ;;  %1702 = vmatprep.subr.bf16.mxu0 %v850_v42 }
 0x1a9   : > { %v772_v45 = vadd.f32 %v2686_v30, %v600_v44  ;;  %v602_v46 = vpop.f32.mrb[5].mxu0  ;;  %1703 = vmatpush3.bf16.xpose.msra.mxu0 %v850_v42  ;;  %1718 = vmatprep.mubr.bf16.mxu0 %v842_v43 }
 0x1aa   : > { %v604_v47 = vpop.f32.mrb[6].mxu0  ;;  %v808_v50 = vadd.f32 %v2689_v32, %v602_v46 }
 0x1ab   : > { %v773_v48 = vadd.f32 %v2686_v30, %v604_v47  ;;  %v606_v49 = vpop.f32.mrb[7].mxu0  ;;  %v2699_v52 = vmul.f32 0.088388346, %v772_v45 }
 0x1ac   : > { %v809_v51 = vadd.f32 %v2689_v32, %v606_v49 }
 0x1ad   : > { %v2701_v53 = vmul.f32 0.088388346, %v773_v48 }
 0x1ae   : > { %v851_v54 = vpack.c.bf16 %v809_v51, %v808_v50 }
 0x1af   : > { %v843_v55 = vpack.c.bf16 %v2701_v53, %v2699_v52  ;;  %v1955_v52 = vld [vmem:[%s2617_s14 + $0x38] ss:$12 sps:$4 sm:$0xff]   ;;  %v1956_v53 = vld [vmem:[%s2617_s14 + $0x50] ss:$12 sps:$4 sm:$0xff]  }
 0x1b0   : > { %v610_v56 = vpop.f32.mrb[8].mxu0  ;;  %1704 = vmatprep.subr.bf16.mxu0 %v851_v54 }
 0x1b1   : > { %v774_v57 = vadd.f32 %v2686_v30, %v610_v56  ;;  %v612_v58 = vpop.f32.mrb[9].mxu0  ;;  %1705 = vmatpush3.bf16.xpose.msra.mxu0 %v851_v54 }
 0x1b2   : > { %v614_v59 = vpop.f32.mrb[10].mxu0  ;;  %v810_v62 = vadd.f32 %v2689_v32, %v612_v58 }
 0x1b3   : > { %v775_v60 = vadd.f32 %v2686_v30, %v614_v59  ;;  %v616_v61 = vpop.f32.mrb[11].mxu0  ;;  %v2709_v0 = vmul.f32 0.088388346, %v774_v57 }
 0x1b4   : > { %v811_v63 = vadd.f32 %v2689_v32, %v616_v61 }
 0x1b5   : > { %v2711_v1 = vmul.f32 0.088388346, %v775_v60 }
 0x1b6   : > { %v852_v2 = vpack.c.bf16 %v811_v63, %v810_v62 }
 0x1b7   : > { %v844_v3 = vpack.c.bf16 %v2711_v1, %v2709_v0  ;;  %v1958_v0 = vld [vmem:[%s2617_s14 + $0x80] ss:$12 sps:$4 sm:$0xff]   ;;  %v1959_v1 = vld [vmem:[%s2617_s14 + $0x98] ss:$12 sps:$4 sm:$0xff]  }
 0x1b8   : > { %v620_v4 = vpop.f32.mrb[12].mxu0  ;;  %1706 = vmatprep.subr.bf16.mxu0 %v852_v2 }
 0x1b9   : > { %v776_v5 = vadd.f32 %v2686_v30, %v620_v4  ;;  %v622_v6 = vpop.f32.mrb[13].mxu0  ;;  %1707 = vmatpush3.bf16.xpose.msra.mxu0 %v852_v2 }
 0x1ba   : > { %v624_v7 = vpop.f32.mrb[14].mxu0  ;;  %v812_v10 = vadd.f32 %v2689_v32, %v622_v6 }
 0x1bb   : > { %v777_v8 = vadd.f32 %v2686_v30, %v624_v7  ;;  %v626_v9 = vpop.f32.mrb[15].mxu0  ;;  %v2719_v12 = vmul.f32 0.088388346, %v776_v5 }
 0x1bc   : > { %v813_v11 = vadd.f32 %v2689_v32, %v626_v9 }
 0x1bd   : > { %v2721_v13 = vmul.f32 0.088388346, %v777_v8 }
 0x1be   : > { %v853_v14 = vpack.c.bf16 %v813_v11, %v812_v10 }
 0x1bf   : > { %v845_v15 = vpack.c.bf16 %v2721_v13, %v2719_v12 }
 0x1c0   : > { %v630_v16 = vpop.f32.mrb[16].mxu0  ;;  %1708 = vmatprep.subr.bf16.mxu0 %v853_v14 }
 0x1c1   : > { %v778_v17 = vadd.f32 %v2686_v30, %v630_v16  ;;  %v632_v25 = vpop.f32.mrb[17].mxu0  ;;  %1709 = vmatpush3.bf16.xpose.msra.mxu0 %v853_v14 }
 0x1c2   : > { %v634_v27 = vpop.f32.mrb[18].mxu0  ;;  %v814_v33 = vadd.f32 %v2689_v32, %v632_v25 }
 0x1c3   : > { %v779_v29 = vadd.f32 %v2686_v30, %v634_v27  ;;  %v636_v31 = vpop.f32.mrb[19].mxu0  ;;  %v794_v35 = vmul.f32 0.088388346, %v778_v17 }
 0x1c4   : > { %v815_v34 = vadd.f32 %v2689_v32, %v636_v31 }
 0x1c5   : > { %v795_v36 = vmul.f32 0.088388346, %v779_v29 }
 0x1c6   : > { %v854_v37 = vpack.c.bf16 %v815_v34, %v814_v33 }
 0x1c7   : > { %v846_v38 = vpack.c.bf16 %v795_v36, %v794_v35 }
 0x1c8   : > { %v640_v39 = vpop.f32.mrb[20].mxu0  ;;  %1710 = vmatprep.subr.bf16.mxu0 %v854_v37 }
 0x1c9   : > { %v780_v40 = vadd.f32 %v2686_v30, %v640_v39  ;;  %v642_v41 = vpop.f32.mrb[21].mxu0  ;;  %1711 = vmatpush3.bf16.xpose.msra.mxu0 %v854_v37 }
 0x1ca   : > { %v644_v42 = vpop.f32.mrb[22].mxu0  ;;  %v816_v45 = vadd.f32 %v2689_v32, %v642_v41 }
 0x1cb   : > { %v781_v43 = vadd.f32 %v2686_v30, %v644_v42  ;;  %v646_v44 = vpop.f32.mrb[23].mxu0  ;;  %v796_v47 = vmul.f32 0.088388346, %v780_v40 }
 0x1cc   : > { %v817_v46 = vadd.f32 %v2689_v32, %v646_v44 }
 0x1cd   : > { %v797_v48 = vmul.f32 0.088388346, %v781_v43 }
 0x1ce   : > { %v855_v49 = vpack.c.bf16 %v817_v46, %v816_v45 }
 0x1cf   : > { %v847_v50 = vpack.c.bf16 %v797_v48, %v796_v47 }
 0x1d0   : > { %v650_v51 = vpop.f32.mrb[24].mxu0  ;;  %1712 = vmatprep.subr.bf16.mxu0 %v855_v49 }
 0x1d1   : > { %v782_v54 = vadd.f32 %v2686_v30, %v650_v51  ;;  %v652_v56 = vpop.f32.mrb[25].mxu0  ;;  %1713 = vmatpush3.bf16.xpose.msra.mxu0 %v855_v49 }
 0x1d2   : > { %v654_v57 = vpop.f32.mrb[26].mxu0  ;;  %v818_v60 = vadd.f32 %v2689_v32, %v652_v56 }
 0x1d3   : > { %v783_v58 = vadd.f32 %v2686_v30, %v654_v57  ;;  %v656_v59 = vpop.f32.mrb[27].mxu0  ;;  %v798_v62 = vmul.f32 0.088388346, %v782_v54 }
 0x1d4   : > { %v819_v61 = vadd.f32 %v2689_v32, %v656_v59 }
 0x1d5   : > { %v799_v63 = vmul.f32 0.088388346, %v783_v58 }
 0x1d6   : > { %v856_v2 = vpack.c.bf16 %v819_v61, %v818_v60 }
 0x1d7   : > { %v848_v4 = vpack.c.bf16 %v799_v63, %v798_v62 }
 0x1d8   : > { %v660_v5 = vpop.f32.mrb[28].mxu0  ;;  %1714 = vmatprep.subr.bf16.mxu0 %v856_v2 }
 0x1d9   : > { %v784_v6 = vadd.f32 %v2686_v30, %v660_v5  ;;  %v662_v7 = vpop.f32.mrb[29].mxu0  ;;  %1715 = vmatpush3.bf16.xpose.msra.mxu0 %v856_v2 }
 0x1da   : > { %v664_v8 = vpop.f32.mrb[30].mxu0  ;;  %v820_v11 = vadd.f32 %v2689_v32, %v662_v7 }
 0x1db   : > { %v785_v9 = vadd.f32 %v2686_v30, %v664_v8  ;;  %v666_v10 = vpop.f32.mrb[31].mxu0  ;;  %v800_v13 = vmul.f32 0.088388346, %v784_v6  ;;  %v1953_v30 = vld [vmem:[%s2617_s14 + $0x8] ss:$12 sps:$4 sm:$0xff]  }
 0x1dc   : > { %v821_v12 = vadd.f32 %v2689_v32, %v666_v10  ;;  %v1954_v32 = vld [vmem:[%s2617_s14 + $0x20] ss:$12 sps:$4 sm:$0xff]   ;;  %1670 = vmatprep.subr.bf16.mxu1 %v1953_v30 }
 0x1dd   : > { %v801_v14 = vmul.f32 0.088388346, %v785_v9  ;;  %1671 = vmatpush3.bf16.msra.mxu1 %v1953_v30 }
 0x1de   : > { %v857_v16 = vpack.c.bf16 %v821_v12, %v820_v11  ;;  %1672 = vmatprep.subr.bf16.mxu1 %v1954_v32 }
 0x1df   : > { %v849_v17 = vpack.c.bf16 %v801_v14, %v800_v13 }
 0x1e0   : > { %1716 = vmatprep.subr.bf16.mxu0 %v857_v16 }
 0x1e1   : > { %1717 = vmatpush3.bf16.xpose.msra.mxu0 %v857_v16  ;;  %1673 = vmatpush3.bf16.msra.mxu1 %v1954_v32 }
 0x1e2   : > { %1674 = vmatprep.subr.bf16.mxu1 %v1955_v52 }
 0x1e5   : > { %1675 = vmatpush3.bf16.msra.mxu1 %v1955_v52 }
 0x1e6   : > { %1676 = vmatprep.subr.bf16.mxu1 %v1956_v53 }
 0x1e8   : > { %1719 = vmatmul.mubr.bf16.vlgmr.msra.gmra.mrb[32].mxu0 %v843_v55  ;;  %v1957_v55 = vld [vmem:[%s2617_s14 + $0x68] ss:$12 sps:$4 sm:$0xff]  }
 0x1e9   : > { %1722 = vmatprep.mubr.bf16.mxu0 %v844_v3  ;;  %1677 = vmatpush3.bf16.msra.mxu1 %v1956_v53  ;;  %v1960_v3 = vld [vmem:[%s2617_s14 + $0xb0] ss:$12 sps:$4 sm:$0xff]   ;;  %s2133_s14 = scalar_lea.vmem %s2919_s15, 2048 }
 0x1ea   : > { %1678 = vmatprep.subr.bf16.mxu1 %v1957_v55  ;;  %p2134_p12 = scmp.ne.s32.totalorder %s2919_s15, %s2133_s14 }
 0x1ec   : > { %p2135_p13 = pnand %p2134_p12, %p3033_p2 }
 0x1ed   : > { %1679 = vmatpush3.bf16.msra.mxu1 %v1957_v55 }
 0x1ee   : > { %1680 = vmatprep.subr.bf16.mxu1 %v1958_v0  ;;  %p2136_p0 = pneg %p2135_p13 }
 0x1f0   : > { %1723 = vmatmul.mubr.bf16.gmra.mrb[36].mxu0 %v845_v15 }
 0x1f1   : > { %1726 = vmatprep.mubr.bf16.mxu0 %v846_v38  ;;  %1681 = vmatpush3.bf16.msra.mxu1 %v1958_v0  ;;  %v824_v38 = vsub.s32 2, %v2676_v26 }
 0x1f2   : > { %1682 = vmatprep.subr.bf16.mxu1 %v1959_v1 }
 0x1f3   : > { %v2794_v44 = vrot.slane %v2682_v28, %v824_v38 }
 0x1f5   : > { %1683 = vmatpush3.bf16.msra.mxu1 %v1959_v1 }
 0x1f6   : > { %1684 = vmatprep.subr.bf16.mxu1 %v1960_v3 }
 0x1f8   : > { %1727 = vmatmul.mubr.bf16.gmra.mrb[40].mxu0 %v847_v50 }
 0x1f9   : > { %1730 = vmatprep.mubr.bf16.mxu0 %v848_v4  ;;  %1685 = vmatpush3.bf16.msra.mxu1 %v1960_v3 }
 0x1fc   : > { %1687 = vmatmul.mubr.bf16.vlgmr.msra.gmra.mrb[0].mxu1 %v2648_v18 }
 0x1fd   : > { %1690 = vmatprep.mubr.bf16.mxu1 %v2652_v19 }
 0x200   : > { %1731 = vmatmul.mubr.bf16.gmra.mrb[44].mxu0 %v849_v17 }
 0x204   : > { %1691 = vmatmul.mubr.bf16.gmra.mrb[4].mxu1 %v2656_v20 }
 0x205   : > { %1694 = vmatprep.mubr.bf16.mxu1 %v2660_v21 }
 0x20c   : > { %1695 = vmatmul.mubr.bf16.gmra.mrb[8].mxu1 %v2664_v22 }
 0x20d   : > { %1698 = vmatprep.mubr.bf16.mxu1 %v2668_v23 }
 0x214   : > { %1699 = vmatmul.mubr.bf16.gmra.mrb[12].mxu1 %v2672_v24 }
 0x2bb   : > { %v1720_v15 = vpop.f32.mrb[32].mxu0 }
 0x2bc   : > { %959 = vmax.xlane.f32.xlu1 %v1720_v15  ;;  %v892_v25 = vpop.f32.mrb[33].mxu0 }
 0x2bd   : > { %955 = vmax.xlane.f32.xlu0 %v892_v25  ;;  %v1721_v27 = vpop.f32.mrb[34].mxu0 }
 0x2be   : > { %v895_v29 = vpop.f32.mrb[35].mxu0 }
 0x2c0   : > { %961 = vmax.xlane.f32.xlu1 %v1721_v27 }
 0x2c1   : > { %957 = vmax.xlane.f32.xlu0 %v895_v29 }
 0x2c3   : > { %v2762_v18 = vpop.f32.mrb[36].mxu0 }
 0x2c4   : > { %v908_v19 = vpop.f32.mrb[37].mxu0 }
 0x2c5   : > { %963 = vmax.xlane.f32.xlu0 %v908_v19  ;;  %v2764_v20 = vpop.f32.mrb[38].mxu0 }
 0x2c6   : > { %v911_v21 = vpop.f32.mrb[39].mxu0 }
 0x2c7   : > { %965 = vmax.xlane.f32.xlu1 %v911_v21 }
 0x2c9   : > { %967 = vmax.xlane.f32.xlu0 %v2762_v18 }
 0x2cb   : > { %969 = vmax.xlane.f32.xlu1 %v2764_v20  ;;  %v2768_v22 = vpop.f32.mrb[40].mxu0 }
 0x2cc   : > { %v2770_v23 = vpop.f32.mrb[41].mxu0 }
 0x2cd   : > { %971 = vmax.xlane.f32.xlu0 %v2770_v23  ;;  %v2773_v24 = vpop.f32.mrb[42].mxu0 }
 0x2ce   : > { %v2775_v31 = vpop.f32.mrb[43].mxu0 }
 0x2cf   : > { %973 = vmax.xlane.f32.xlu1 %v2775_v31  ;;  %v1688_v49 = vpop.f32.mrb[0].mxu1 }
 0x2d0   : > { %v828_v50 = vadd.f32 %v1688_v49, %v2794_v44  ;;  %v703_v51 = vpop.f32.mrb[1].mxu1 }
 0x2d1   : > { %975 = vmax.xlane.f32.xlu0 %v2768_v22  ;;  %v826_v56 = vadd.f32 %v2794_v44, %v703_v51  ;;  %v1689_v57 = vpop.f32.mrb[2].mxu1 }
 0x2d2   : > { %v829_v60 = vadd.f32 %v1689_v57, %v2794_v44  ;;  %v706_v61 = vpop.f32.mrb[3].mxu1 }
 0x2d3   : > { %977 = vmax.xlane.f32.xlu1 %v2773_v24  ;;  %v2780_v33 = vpop.f32.mrb[44].mxu0  ;;  %v827_v63 = vadd.f32 %v2794_v44, %v706_v61 }
 0x2d4   : > { %v2782_v34 = vpop.f32.mrb[45].mxu0  ;;  %v1108_v4 = vpack.c.bf16 %v829_v60, %v828_v50 }
 0x2d5   : > { %979 = vmax.xlane.f32.xlu0 %v2782_v34  ;;  %v2785_v35 = vpop.f32.mrb[46].mxu0  ;;  %v1107_v7 = vpack.c.bf16 %v827_v63, %v826_v56 }
 0x2d6   : > { %v2787_v36 = vpop.f32.mrb[47].mxu0 }
 0x2d7   : > { %981 = vmax.xlane.f32.xlu1 %v2787_v36  ;;  %v1692_v11 = vpop.f32.mrb[4].mxu1  ;;  %1734 = vmatprep.subr.bf16.mxu1 %v1107_v7 }
 0x2d8   : > { %v832_v13 = vadd.f32 %v1692_v11, %v2794_v44  ;;  %v719_v14 = vpop.f32.mrb[5].mxu1  ;;  %1735 = vmatpush3.bf16.msra.mxu1 %v1107_v7 }
 0x2d9   : > { %983 = vmax.xlane.f32.xlu0 %v2780_v33  ;;  %v830_v32 = vadd.f32 %v2794_v44, %v719_v14  ;;  %v1693_v52 = vpop.f32.mrb[6].mxu1  ;;  %1736 = vmatprep.subr.bf16.mxu1 %v1108_v4 }
 0x2da   : > { %v833_v55 = vadd.f32 %v1693_v52, %v2794_v44  ;;  %v722_v0 = vpop.f32.mrb[7].mxu1 }
 0x2db   : > { %985 = vmax.xlane.f32.xlu1 %v2785_v35 }
 0x2dc   : > { %1737 = vmatpush3.bf16.msra.mxu1 %v1108_v4 }
 0x349   : > { %v960_v37 = vpop.xlane.xlu1 %959 }
 0x34a   : > { %v989_v39 = vsub.f32 %v1720_v15, %v960_v37  ;;  %v956_v40 = vpop.xlane.xlu0 %955  ;;  %v831_v15 = vadd.f32 %v2794_v44, %v722_v0 }
 0x34b   : > { %v987_v41 = vsub.f32 %v892_v25, %v956_v40 }
 0x34c   : > { %v1007_v45 = vmul.f32 1.442695, %v989_v39  ;;  %v1696_v39 = vpop.f32.mrb[8].mxu1 }
 0x34d   : > { %v1003_v42 = vmul.f32 1.442695, %v987_v41  ;;  %v962_v43 = vpop.xlane.xlu1 %961 }
 0x34e   : > { %v990_v46 = vsub.f32 %v1721_v27, %v962_v43  ;;  %v958_v47 = vpop.xlane.xlu0 %957  ;;  %v735_v43 = vpop.f32.mrb[9].mxu1 }
 0x34f   : > { %1969 = vpow2.f32 %v1003_v42  ;;  %v988_v48 = vsub.f32 %v895_v29, %v958_v47  ;;  %v1110_v29 = vpack.c.bf16 %v833_v55, %v832_v13  ;;  %v836_v42 = vadd.f32 %v1696_v39, %v2794_v44 }
 0x350   : > { %1971 = vpow2.f32 %v1007_v45  ;;  %v1009_v58 = vmul.f32 1.442695, %v990_v46  ;;  %v834_v47 = vadd.f32 %v2794_v44, %v735_v43 }
 0x351   : > { %v1005_v54 = vmul.f32 1.442695, %v988_v48  ;;  %v1697_v48 = vpop.f32.mrb[10].mxu1 }
 0x352   : > { %v964_v59 = vpop.xlane.xlu0 %963  ;;  %v837_v49 = vadd.f32 %v1697_v48, %v2794_v44  ;;  %v738_v50 = vpop.f32.mrb[11].mxu1 }
 0x353   : > { %1973 = vpow2.f32 %v1005_v54  ;;  %v991_v62 = vsub.f32 %v908_v19, %v964_v59  ;;  %v835_v56 = vadd.f32 %v2794_v44, %v738_v50  ;;  %v1700_v4 = vpop.f32.mrb[12].mxu1 }
 0x354   : > { %v966_v2 = vpop.xlane.xlu1 %965  ;;  %1975 = vpow2.f32 %v1009_v58  ;;  %v1112_v58 = vpack.c.bf16 %v837_v49, %v836_v42  ;;  %v840_v7 = vadd.f32 %v1700_v4, %v2794_v44 }
 0x355   : > { %v1011_v5 = vmul.f32 1.442695, %v991_v62  ;;  %v992_v6 = vsub.f32 %v911_v21, %v966_v2  ;;  %v1109_v21 = vpack.c.bf16 %v831_v15, %v830_v32  ;;  %v1111_v62 = vpack.c.bf16 %v835_v56, %v834_v47  ;;  %v1962_v56 = vld [vmem:[%s2624_s19 + $0x8] sm:$0xff]  }
 0x356   : > { %v968_v8 = vpop.xlane.xlu0 %967 }
 0x357   : > { %1977 = vpow2.f32 %v1011_v5  ;;  %v1013_v9 = vmul.f32 1.442695, %v992_v6  ;;  %v993_v10 = vsub.f32 %v2762_v18, %v968_v8  ;;  %1738 = vmatprep.subr.bf16.mxu1 %v1109_v21  ;;  %v751_v8 = vpop.f32.mrb[13].mxu1 }
 0x358   : > { %v970_v12 = vpop.xlane.xlu1 %969  ;;  %1739 = vmatpush3.bf16.msra.mxu1 %v1109_v21  ;;  %v838_v11 = vadd.f32 %v2794_v44, %v751_v8 }
 0x359   : > { %v2802_v16 = vpop.eup %1969  ;;  %v1015_v17 = vmul.f32 1.442695, %v993_v10  ;;  %v994_v30 = vsub.f32 %v2764_v20, %v970_v12  ;;  %1979 = vpow2.f32 %v1013_v9  ;;  %1740 = vmatprep.subr.bf16.mxu1 %v1110_v29  ;;  %v1701_v12 = vpop.f32.mrb[14].mxu1 }
 0x35a   : > { %v972_v53 = vpop.xlane.xlu0 %971  ;;  %1035 = vadd.xlane.f32.xlu0 %v2802_v16  ;;  %v2810_v25 = vpop.eup %1971 }
 0x35b   : > { %1981 = vpow2.f32 %v1015_v17  ;;  %v1017_v1 = vmul.f32 1.442695, %v994_v30  ;;  %v995_v3 = vsub.f32 %v2770_v23, %v972_v53  ;;  %v754_v13 = vpop.f32.mrb[15].mxu1 }
 0x35c   : > { %v974_v27 = vpop.xlane.xlu1 %973  ;;  %1741 = vmatpush3.bf16.msra.mxu1 %v1110_v29  ;;  %v839_v17 = vadd.f32 %v2794_v44, %v754_v13 }
 0x35d   : > { %v2812_v18 = vpop.eup %1973  ;;  %v1019_v19 = vmul.f32 1.442695, %v995_v3  ;;  %v996_v20 = vsub.f32 %v2775_v31, %v974_v27  ;;  %1983 = vpow2.f32 %v1017_v1  ;;  %1742 = vmatprep.subr.bf16.mxu1 %v1111_v62  ;;  %v1961_v3 = vld [vmem:[%s2624_s19] sm:$0xff]  }
 0x35e   : > { %v976_v37 = vpop.xlane.xlu0 %975  ;;  %1039 = vadd.xlane.f32.xlu0 %v2810_v25  ;;  %1037 = vadd.xlane.f32.xlu1 %v2812_v18  ;;  %v2818_v40 = vpop.eup %1975  ;;  %v1113_v52 = vpack.c.bf16 %v839_v17, %v838_v11  ;;  %v1965_v11 = vld [vmem:[%s2624_s19 + $0x20] sm:$0xff]  }
 0x35f   : > { %1985 = vpow2.f32 %v1019_v19  ;;  %v1021_v23 = vmul.f32 1.442695, %v996_v20  ;;  %v997_v38 = vsub.f32 %v2768_v22, %v976_v37 }
 0x360   : > { %v978_v41 = vpop.xlane.xlu1 %977  ;;  %1743 = vmatpush3.bf16.msra.mxu1 %v1111_v62 }
 0x361   : > { %v2821_v31 = vpop.eup %1977  ;;  %v1023_v45 = vmul.f32 1.442695, %v997_v38  ;;  %v998_v46 = vsub.f32 %v2773_v24, %v978_v41  ;;  %1987 = vpow2.f32 %v1021_v23  ;;  %1744 = vmatprep.subr.bf16.mxu1 %v1112_v58 }
 0x362   : > { %1043 = vadd.xlane.f32.xlu0 %v2821_v31  ;;  %v980_v22 = vpop.xlane.xlu0 %979  ;;  %1041 = vadd.xlane.f32.xlu1 %v2818_v40 }
 0x363   : > { %1989 = vpow2.f32 %v1023_v45  ;;  %v1025_v51 = vmul.f32 1.442695, %v998_v46  ;;  %v999_v54 = vsub.f32 %v2782_v34, %v980_v22  ;;  %v2830_v24 = vpop.eup %1979 }
 0x364   : > { %v982_v57 = vpop.xlane.xlu1 %981  ;;  %1745 = vmatpush3.bf16.msra.mxu1 %v1112_v58 }
 0x365   : > { %v2832_v59 = vpop.eup %1981  ;;  %v1027_v60 = vmul.f32 1.442695, %v999_v54  ;;  %v1000_v61 = vsub.f32 %v2787_v36, %v982_v57  ;;  %1991 = vpow2.f32 %v1025_v51  ;;  %1746 = vmatprep.subr.bf16.mxu1 %v1113_v52 }
 0x366   : > { %1047 = vadd.xlane.f32.xlu0 %v2832_v59  ;;  %v984_v63 = vpop.xlane.xlu0 %983  ;;  %1045 = vadd.xlane.f32.xlu1 %v2830_v24 }
 0x367   : > { %1993 = vpow2.f32 %v1027_v60  ;;  %v1029_v34 = vmul.f32 1.442695, %v1000_v61  ;;  %v1001_v2 = vsub.f32 %v2780_v33, %v984_v63  ;;  %v2838_v5 = vpop.eup %1983  ;;  %v841_v33 = vadd.f32 %v1701_v12, %v2794_v44 }
 0x368   : > { %v986_v6 = vpop.xlane.xlu1 %985  ;;  %1747 = vmatpush3.bf16.msra.mxu1 %v1113_v52 }
 0x369   : > { %v2841_v36 = vpop.eup %1985  ;;  %v1031_v9 = vmul.f32 1.442695, %v1001_v2  ;;  %v1002_v10 = vsub.f32 %v2785_v35, %v986_v6  ;;  %1995 = vpow2.f32 %v1029_v34  ;;  %v1114_v32 = vpack.c.bf16 %v841_v33, %v840_v7 }
 0x36a   : > { %1051 = vadd.xlane.f32.xlu0 %v2841_v36  ;;  %1049 = vadd.xlane.f32.xlu1 %v2838_v5 }
 0x36b   : > { %1997 = vpow2.f32 %v1031_v9  ;;  %v1033_v14 = vmul.f32 1.442695, %v1002_v10  ;;  %v2849_v30 = vpop.eup %1987  ;;  %1748 = vmatprep.subr.bf16.mxu1 %v1114_v32 }
 0x36c   : > { %1749 = vmatpush3.bf16.msra.mxu1 %v1114_v32  ;;  %v1966_v32 = vld [vmem:[%s2624_s19 + $0x28] sm:$0xff]  }
 0x36d   : > { %v2851_v35 = vpop.eup %1989  ;;  %1999 = vpow2.f32 %v1033_v14  ;;  %1766 = vmatprep.subr.bf16.mxu1 %v1961_v3 }
 0x36e   : > { %1055 = vadd.xlane.f32.xlu0 %v2851_v35  ;;  %1053 = vadd.xlane.f32.xlu1 %v2849_v30 }
 0x36f   : > { %v2855_v53 = vpop.eup %1991 }
 0x371   : > { %v2857_v55 = vpop.eup %1993 }
 0x372   : > { %1059 = vadd.xlane.f32.xlu0 %v2857_v55  ;;  %1057 = vadd.xlane.f32.xlu1 %v2855_v53 }
 0x373   : > { %v2861_v44 = vpop.eup %1995 }
 0x375   : > { %v2863_v0 = vpop.eup %1997 }
 0x376   : > { %1063 = vadd.xlane.f32.xlu0 %v2863_v0  ;;  %1061 = vadd.xlane.f32.xlu1 %v2861_v44 }
 0x377   : > { %v2867_v1 = vpop.eup %1999 }
 0x37a   : > { %1065 = vadd.xlane.f32.xlu1 %v2867_v1 }
 0x3e7   : > { %v1036_v15 = vpop.xlane.xlu0 %1035 }
 0x3e8   : > { %2001 = vrcp.f32 %v1036_v15 }
 0x3eb   : > { %v1040_v27 = vpop.xlane.xlu0 %1039  ;;  %v1038_v29 = vpop.xlane.xlu1 %1037 }
 0x3ec   : > { %2003 = vrcp.f32 %v1038_v29 }
 0x3ed   : > { %2005 = vrcp.f32 %v1040_v27 }
 0x3ef   : > { %v1044_v19 = vpop.xlane.xlu0 %1043  ;;  %v1042_v20 = vpop.xlane.xlu1 %1041 }
 0x3f0   : > { %2007 = vrcp.f32 %v1042_v20  ;;  %v1968_v20 = vld [vmem:[%s2624_s19 + $0x38] sm:$0xff]  }
 0x3f1   : > { %2009 = vrcp.f32 %v1044_v19 }
 0x3f2   : > { %v2002_v23 = vpop.eup %2001 }
 0x3f3   : > { %v1048_v21 = vpop.xlane.xlu0 %1047  ;;  %v1046_v37 = vpop.xlane.xlu1 %1045  ;;  %v1083_v42 = vmul.f32 %v2002_v23, %v2802_v16 }
 0x3f4   : > { %2011 = vrcp.f32 %v1046_v37 }
 0x3f5   : > { %2013 = vrcp.f32 %v1048_v21 }
 0x3f6   : > { %v2004_v38 = vpop.eup %2003 }
 0x3f7   : > { %v1052_v39 = vpop.xlane.xlu0 %1051  ;;  %v1050_v41 = vpop.xlane.xlu1 %1049  ;;  %v1084_v43 = vmul.f32 %v2004_v38, %v2812_v18 }
 0x3f8   : > { %v2006_v45 = vpop.eup %2005  ;;  %2015 = vrcp.f32 %v1050_v41 }
 0x3f9   : > { %v1099_v46 = vpack.c.bf16 %v1084_v43, %v1083_v42  ;;  %2017 = vrcp.f32 %v1052_v39  ;;  %v1085_v49 = vmul.f32 %v2006_v45, %v2810_v25 }
 0x3fa   : > { %v2008_v47 = vpop.eup %2007 }
 0x3fb   : > { %v1056_v48 = vpop.xlane.xlu0 %1055  ;;  %v1054_v22 = vpop.xlane.xlu1 %1053  ;;  %v1086_v50 = vmul.f32 %v2008_v47, %v2818_v40  ;;  %1750 = vmatprep.mubr.bf16.mxu1 %v1099_v46  ;;  %v1963_v40 = vld [vmem:[%s2624_s19 + $0x10] sm:$0xff]  }
 0x3fc   : > { %v2010_v51 = vpop.eup %2009  ;;  %2019 = vrcp.f32 %v1054_v22 }
 0x3fd   : > { %v1100_v54 = vpack.c.bf16 %v1086_v50, %v1085_v49  ;;  %2021 = vrcp.f32 %v1056_v48  ;;  %v1087_v58 = vmul.f32 %v2010_v51, %v2821_v31 }
 0x3fe   : > { %v2012_v16 = vpop.eup %2011 }
 0x3ff   : > { %v1060_v18 = vpop.xlane.xlu0 %1059  ;;  %v1058_v57 = vpop.xlane.xlu1 %1057  ;;  %1751 = vmatmul.mubr.bf16.vlgmr.msra.gmra.mrb[16].mxu1 %v1100_v54  ;;  %v1088_v60 = vmul.f32 %v2012_v16, %v2830_v24  ;;  %v1964_v24 = vld [vmem:[%s2624_s19 + $0x18] sm:$0xff]  }
 0x400   : > { %v2014_v61 = vpop.eup %2013  ;;  %2023 = vrcp.f32 %v1058_v57  ;;  %1767 = vmatpush3.bf16.msra.mxu1 %v1961_v3  ;;  %v1238_v57 = vsub.s32 3, %v2676_v26 }
 0x401   : > { %v1101_v25 = vpack.c.bf16 %v1088_v60, %v1087_v58  ;;  %1768 = vmatprep.subr.bf16.mxu1 %v1962_v56  ;;  %2025 = vrcp.f32 %v1060_v18  ;;  %v1089_v2 = vmul.f32 %v2014_v61, %v2832_v59 }
 0x402   : > { %v2016_v62 = vpop.eup %2015  ;;  %v1239_v58 = vrot.slane %v2682_v28, %v1238_v57 }
 0x403   : > { %v1064_v63 = vpop.xlane.xlu0 %1063  ;;  %v1062_v34 = vpop.xlane.xlu1 %1061  ;;  %1754 = vmatprep.mubr.bf16.mxu1 %v1101_v25  ;;  %v1090_v4 = vmul.f32 %v2016_v62, %v2838_v5 }
 0x404   : > { %v2018_v6 = vpop.eup %2017  ;;  %2027 = vrcp.f32 %v1062_v34  ;;  %1769 = vmatpush3.bf16.msra.mxu1 %v1962_v56 }
 0x405   : > { %2029 = vrcp.f32 %v1064_v63  ;;  %v1102_v31 = vpack.c.bf16 %v1090_v4, %v1089_v2  ;;  %1770 = vmatprep.subr.bf16.mxu1 %v1963_v40  ;;  %v1091_v9 = vmul.f32 %v2018_v6, %v2841_v36 }
 0x406   : > { %v2020_v7 = vpop.eup %2019 }
 0x407   : > { %v1066_v8 = vpop.xlane.xlu1 %1065  ;;  %1755 = vmatmul.mubr.bf16.gmra.mrb[20].mxu1 %v1102_v31  ;;  %v1092_v10 = vmul.f32 %v2020_v7, %v2849_v30  ;;  %v2022_v59 = vpop.eup %2021 }
 0x408   : > { %2031 = vrcp.f32 %v1066_v8  ;;  %1771 = vmatpush3.bf16.msra.mxu1 %v1963_v40  ;;  %v1093_v33 = vmul.f32 %v2022_v59, %v2851_v35  ;;  %v1967_v35 = vld [vmem:[%s2624_s19 + $0x30] sm:$0xff]   ;;  %s2139_s19 = scalar_lea.vmem %s2138_s1, 4096 }
 0x409   : > { %v1103_v5 = vpack.c.bf16 %v1092_v10, %v1091_v9  ;;  %1772 = vmatprep.subr.bf16.mxu1 %v1964_v24  ;;  %p2141_p10 = scmp.lt.s32.totalorder %s2139_s19, %s2133_s14 }
 0x40a   : > { %v2024_v12 = vpop.eup %2023 }
 0x40b   : > { %1758 = vmatprep.mubr.bf16.mxu1 %v1103_v5  ;;  %v1094_v13 = vmul.f32 %v2024_v12, %v2855_v53  ;;  %v2026_v14 = vpop.eup %2025  ;;  %p2142_p8 = por %p2141_p10, %p2140_p3 }
 0x40c   : > { %1773 = vmatpush3.bf16.msra.mxu1 %v1964_v24  ;;  %v1095_v30 = vmul.f32 %v2026_v14, %v2857_v55 }
 0x40d   : > { %v1104_v17 = vpack.c.bf16 %v1094_v13, %v1093_v33  ;;  %1774 = vmatprep.subr.bf16.mxu1 %v1965_v11  ;;  %p2143_p7 = pnand %p2142_p8, %p2136_p0 }
 0x40e   : > { %v2028_v36 = vpop.eup %2027 }
 0x40f   : > { %v2030_v52 = vpop.eup %2029  ;;  %1759 = vmatmul.mubr.bf16.gmra.mrb[24].mxu1 %v1104_v17  ;;  %v1096_v3 = vmul.f32 %v2028_v36, %v2861_v44 }
 0x410   : > { %1775 = vmatpush3.bf16.msra.mxu1 %v1965_v11  ;;  %v1097_v53 = vmul.f32 %v2030_v52, %v2863_v0 }
 0x411   : > { %v1105_v27 = vpack.c.bf16 %v1096_v3, %v1095_v30  ;;  %1776 = vmatprep.subr.bf16.mxu1 %v1966_v32 }
 0x412   : > { %v2032_v15 = vpop.eup %2031 }
 0x413   : > { %v1098_v29 = vmul.f32 %v2032_v15, %v2867_v1  ;;  %1762 = vmatprep.mubr.bf16.mxu1 %v1105_v27 }
 0x414   : > { %1777 = vmatpush3.bf16.msra.mxu1 %v1966_v32 }
 0x415   : > { %v1106_v19 = vpack.c.bf16 %v1098_v29, %v1097_v53  ;;  %1778 = vmatprep.subr.bf16.mxu1 %v1967_v35 }
 0x417   : > { %1763 = vmatmul.mubr.bf16.gmra.mrb[28].mxu1 %v1106_v19 }
 0x418   : > { %1779 = vmatpush3.bf16.msra.mxu1 %v1967_v35 }
 0x419   : > { %1780 = vmatprep.subr.bf16.mxu1 %v1968_v20 }
 0x41c   : > { %1781 = vmatpush3.bf16.msra.mxu1 %v1968_v20 }
 0x4d2   : > { %v1752_v55 = vpop.f32.mrb[16].mxu1 }
 0x4d3   : > { %v1149_v44 = vpop.f32.mrb[17].mxu1 }
 0x4d4   : > { %v1753_v21 = vpop.f32.mrb[18].mxu1 }
 0x4d5   : > { %v1213_v37 = vpack.c.bf16 %v1753_v21, %v1752_v55  ;;  %v1152_v23 = vpop.f32.mrb[19].mxu1 }
 0x4d6   : > { %v1212_v38 = vpack.c.bf16 %v1152_v23, %v1149_v44 }
 0x4d8   : > { %1782 = vmatprep.mubr.bf16.mxu1 %v1212_v38 }
 0x4d9   : > { %1783 = vmatmul.mubr.bf16.vlgmr.msra.gmra.mrb[32].mxu1 %v1213_v37 }
 0x4da   : > { %v1756_v0 = vpop.f32.mrb[20].mxu1 }
 0x4db   : > { %v1165_v39 = vpop.f32.mrb[21].mxu1 }
 0x4dc   : > { %v1757_v1 = vpop.f32.mrb[22].mxu1 }
 0x4dd   : > { %v1215_v41 = vpack.c.bf16 %v1757_v1, %v1756_v0  ;;  %v1168_v42 = vpop.f32.mrb[23].mxu1 }
 0x4de   : > { %v1214_v43 = vpack.c.bf16 %v1168_v42, %v1165_v39 }
 0x4e0   : > { %1786 = vmatprep.mubr.bf16.mxu1 %v1214_v43 }
 0x4e1   : > { %1787 = vmatmul.mubr.bf16.gmra.mrb[36].mxu1 %v1215_v41 }
 0x4e2   : > { %v1760_v45 = vpop.f32.mrb[24].mxu1 }
 0x4e3   : > { %v1181_v46 = vpop.f32.mrb[25].mxu1 }
 0x4e4   : > { %v1761_v47 = vpop.f32.mrb[26].mxu1 }
 0x4e5   : > { %v1217_v48 = vpack.c.bf16 %v1761_v47, %v1760_v45  ;;  %v1184_v22 = vpop.f32.mrb[27].mxu1 }
 0x4e6   : > { %v1216_v49 = vpack.c.bf16 %v1184_v22, %v1181_v46 }
 0x4e8   : > { %1790 = vmatprep.mubr.bf16.mxu1 %v1216_v49 }
 0x4e9   : > { %1791 = vmatmul.mubr.bf16.gmra.mrb[40].mxu1 %v1217_v48 }
 0x4ea   : > { %v1764_v50 = vpop.f32.mrb[28].mxu1 }
 0x4eb   : > { %v1197_v51 = vpop.f32.mrb[29].mxu1 }
 0x4ec   : > { %v1765_v54 = vpop.f32.mrb[30].mxu1 }
 0x4ed   : > { %v1219_v56 = vpack.c.bf16 %v1765_v54, %v1764_v50  ;;  %v1200_v16 = vpop.f32.mrb[31].mxu1 }
 0x4ee   : > { %v1218_v18 = vpack.c.bf16 %v1200_v16, %v1197_v51 }
 0x4f0   : > { %1794 = vmatprep.mubr.bf16.mxu1 %v1218_v18 }
 0x4f1   : > { %1795 = vmatmul.mubr.bf16.gmra.mrb[44].mxu1 %v1219_v56 }
 0x5ac   : > { %v1784_v60 = vpop.f32.mrb[32].mxu1 }
 0x5ad   : > { %v1331_v61 = vadd.f32 %v1784_v60, %v1239_v58  ;;  %v1322_v25 = vpop.f32.mrb[33].mxu1 }
 0x5ae   : > { %v1323_v40 = vadd.f32 %v1322_v25, %v1239_v58  ;;  %v1785_v62 = vpop.f32.mrb[34].mxu1 }
 0x5af   : > { %1387 = vst [vmem:[%s2897_s24 + $0x10] sm:$0xff] %v1331_v61  ;;  %v1334_v63 = vadd.f32 %v1785_v62, %v1239_v58  ;;  %v1325_v26 = vpop.f32.mrb[35].mxu1 }
 0x5b0   : > { %1385 = vst [vmem:[%s2897_s24] sm:$0xff] %v1323_v40  ;;  %v1326_v28 = vadd.f32 %v1325_v26, %v1239_v58 }
 0x5b1   : > { %1388 = vst [vmem:[%s2897_s24 + $0x18] sm:$0xff] %v1334_v63 }
 0x5b2   : > { %1386 = vst [vmem:[%s2897_s24 + $0x8] sm:$0xff] %v1326_v28 }
 0x5b4   : > { %v1788_v34 = vpop.f32.mrb[36].mxu1 }
 0x5b5   : > { %v1347_v2 = vadd.f32 %v1788_v34, %v1239_v58  ;;  %v1338_v4 = vpop.f32.mrb[37].mxu1 }
 0x5b6   : > { %v1339_v6 = vadd.f32 %v1338_v4, %v1239_v58  ;;  %v1789_v31 = vpop.f32.mrb[38].mxu1 }
 0x5b7   : > { %1391 = vst [vmem:[%s2897_s24 + $0x30] sm:$0xff] %v1347_v2  ;;  %v1350_v24 = vadd.f32 %v1789_v31, %v1239_v58  ;;  %v1341_v7 = vpop.f32.mrb[39].mxu1 }
 0x5b8   : > { %1389 = vst [vmem:[%s2897_s24 + $0x20] sm:$0xff] %v1339_v6  ;;  %v1342_v8 = vadd.f32 %v1341_v7, %v1239_v58 }
 0x5b9   : > { %1392 = vst [vmem:[%s2897_s24 + $0x38] sm:$0xff] %v1350_v24 }
 0x5ba   : > { %1390 = vst [vmem:[%s2897_s24 + $0x28] sm:$0xff] %v1342_v8 }
 0x5bc   : > { %v1792_v9 = vpop.f32.mrb[40].mxu1 }
 0x5bd   : > { %v1363_v10 = vadd.f32 %v1792_v9, %v1239_v58  ;;  %v1354_v59 = vpop.f32.mrb[41].mxu1 }
 0x5be   : > { %v1355_v5 = vadd.f32 %v1354_v59, %v1239_v58  ;;  %v1793_v11 = vpop.f32.mrb[42].mxu1 }
 0x5bf   : > { %1395 = vst [vmem:[%s2897_s24 + $0x50] sm:$0xff] %v1363_v10  ;;  %v1366_v12 = vadd.f32 %v1793_v11, %v1239_v58  ;;  %v1357_v33 = vpop.f32.mrb[43].mxu1 }
 0x5c0   : > { %1393 = vst [vmem:[%s2897_s24 + $0x40] sm:$0xff] %v1355_v5  ;;  %v1358_v13 = vadd.f32 %v1357_v33, %v1239_v58 }
 0x5c1   : > { %1396 = vst [vmem:[%s2897_s24 + $0x58] sm:$0xff] %v1366_v12 }
 0x5c2   : > { %1394 = vst [vmem:[%s2897_s24 + $0x48] sm:$0xff] %v1358_v13 }
 0x5c4   : > { %v1796_v14 = vpop.f32.mrb[44].mxu1 }
 0x5c5   : > { %v1379_v17 = vadd.f32 %v1796_v14, %v1239_v58  ;;  %v1370_v32 = vpop.f32.mrb[45].mxu1 }
 0x5c6   : > { %v1371_v36 = vadd.f32 %v1370_v32, %v1239_v58  ;;  %v1797_v52 = vpop.f32.mrb[46].mxu1 }
 0x5c7   : > { %1399 = vst [vmem:[%s2897_s24 + $0x70] sm:$0xff] %v1379_v17  ;;  %v1382_v30 = vadd.f32 %v1797_v52, %v1239_v58  ;;  %v1373_v3 = vpop.f32.mrb[47].mxu1 }
 0x5c8   : > { %1397 = vst [vmem:[%s2897_s24 + $0x60] sm:$0xff] %v1371_v36  ;;  %v1374_v15 = vadd.f32 %v1373_v3, %v1239_v58 }
 0x5c9   : > { %1400 = vst [vmem:[%s2897_s24 + $0x78] sm:$0xff] %v1382_v30 }
 0x5ca   : > { %1398 = vst [vmem:[%s2897_s24 + $0x68] sm:$0xff] %v1374_v15 }
 0x5cb   : > { %2146 = shalt.err (!%p2143_p7)
}
 0x5cc   : > { %s2147_s18 = scalar_lea.hbm %s2917_s27, 2048  ;;  %s2151_s0 = scalar_lea.hbm %s2989_s5, 4096 }
 0x5cd   : > { %p2148_p4 = scmp.ne.s32.totalorder %s2917_s27, %s2147_s18  ;;  %p2152_p11 = scmp.lt.u32.totalorder %s2917_s27, %s2989_s5 }
 0x5ce   : > { %p2153_p5 = scmp.lt.u32.totalorder %s2151_s0, %s2147_s18  ;;  %p2155_p12 = scmp.lt.u32.totalorder %s2147_s18, %s2917_s27 }
 0x5cf   : > { %p2149_p6 = pnand %p2148_p4, %p3033_p2 }
 0x5d0   : > { %p2154_p9 = por %p2153_p5, %p2152_p11 }
 0x5d1   : > { %p2150_p1 = pneg %p2149_p6 }
 0x5d2   : > { %p2156_p13 = por %p2155_p12, %p2154_p9 }
 0x5d4   : > { %p2157_p0 = pnand %p2156_p13, %p2150_p1 }
 0x5d6   : > { %2160 = shalt.err (!%p2157_p0)
}
 0x5d7   : > { %s2269_s24 = smov 128   ;;  %s2270_s21 = smov 8  }
 0x5d8   : > { %1811 = dma.vmem_to_hbm [thread:$0]  (%p3033_p2), %s2919_s15, 2048, %s2917_s27, %s1402_s12, %s2269_s24, %s2269_s24, %s2270_s21  }
 0x5d9 PF: > { %s1430_s26 = sand.u32 1, %s2245_s8   ;;  %p3034_p3 = scmp.ne.s32.totalorder %s3017_s6, 0 }
 0x5da   : > { %p3035_p10 = scmp.ge.s32.totalorder %s2257_s11, 2  ;;  %s1431_s28 = scalar_lea.sflag [#allocation6], %s1430_s26 }
 0x5dc   : > { %p1828_p8 = pnand %p3035_p10, %p3034_p3 }
 0x5de   : > { %2216 = dma.done.wait (!%p1828_p8), %s1431_s28, 2048  }
 0x5df   : > { %2218 = vsyncadd (!%p1828_p8), %s1431_s28, 4294965248  ;;  %s3036_s14 = sld [smem:[#allocation20_spill]]  ;;  %s3037_s0 = sld [smem:[#allocation22_spill]] }
 0x5e0   : > { %s3038_s23 = sld [smem:[#allocation21_spill]]  ;;  %s3039_s10 = sld [smem:[#allocation23_spill]] }
 0x5e1   : > { %p25_p2 = scmp.ge.s32.totalorder %s2365_s13, 4   ;;  %s3040_s28 = smov %s2225_s29 }
 0x5e2   : > { %s3041_s29 = smov %s2229_s30  ;;  %s3042_s30 = smov %s2554_s17 }
 0x5e3   : > { %s3043_s6 = smov %s2237_s7  ;;  %s3045_s8 = smov %s2249_s9 }
 0x5e4   : > { %s3047_s11 = smov %s2365_s13  ;;  %27 = sbr.rel (!%p25_p2) target bundleno = 23 (0x17), region = 108 }
 0x5e5   : > { %s3044_s7 = smov %s3036_s14 }
 0x5e6   : > { %s3046_s9 = smov %s3038_s23 }
 0x5eb   :  { %1436 = vsyncpa [#allocation5], 1 }
 0x5ec   :  { %1438 = vsyncpa [#allocation5 + $0x1], 1 }
 0x5ed   :  { %1439 = vsyncpa [#allocation8], 1 }
 0x5ee   :  { %1441 = vsyncpa [#allocation8 + $0x1], 1 }
 0x5ef   :  { %1442 = vsyncpa [#allocation6], 1 }
 0x5f0   :  { %1444 = vsyncpa [#allocation6 + $0x1], 1 }

</bundles_post_ra>
